<compile_context>
chip_gen: v5e
topology: v5e:2x2
jax: 0.10.0
libtpu: 0.0.40
codegen_flags: <defaults>
</compile_context>

<pallas_src>
import functools

import jax
import jax.numpy as jnp
from jax.experimental import pallas as pl
from jax.experimental.pallas import tpu as pltpu

LN_EPS = 1e-5  # PyTorch nn.LayerNorm default


def _round_up(x, m):
    return (x + m - 1) // m * m


def _layernorm(h, gamma, beta, n_real):
    """Single-pass LayerNorm over the last axis (one sum + one sum-of-squares).

    Zero-padded lanes contribute nothing to the sums, the mean/variance divide by
    the REAL feature count, and padded gamma/beta are zero, so padded output lanes
    stay exactly zero."""
    inv_n = 1.0 / float(n_real)
    s = jnp.sum(h, axis=-1, keepdims=True)
    ss = jnp.sum(h * h, axis=-1, keepdims=True)
    mu = s * inv_n
    var = jnp.maximum(ss * inv_n - mu * mu, 0.0)
    return (h - mu) * jax.lax.rsqrt(var + LN_EPS) * gamma + beta


def feedforward_kernel(
    x_ref,
    w1_ref, b1_ref, g1_ref, be1_ref,
    w2_ref, b2_ref, g2_ref, be2_ref,
    w3_ref, b3_ref,
    g4_ref, be4_ref,
    o_ref,
    *, e_real, i_real,
):
    x = x_ref[...].astype(jnp.float32)  # (tm, E_pad), f32

    # Linear(E -> I): bf16 x bf16 -> f32 on the MXU, then fused LN(I) + ReLU.
    # Dropout(p=1e-7) == identity in eval mode.
    h = jnp.dot(x.astype(jnp.bfloat16), w1_ref[...],
                preferred_element_type=jnp.float32) + b1_ref[...]
    h = jnp.maximum(_layernorm(h, g1_ref[...], be1_ref[...], i_real), 0.0)

    # Linear(I -> I) + LN(I) + ReLU.
    h = jnp.dot(h.astype(jnp.bfloat16), w2_ref[...],
                preferred_element_type=jnp.float32) + b2_ref[...]
    h = jnp.maximum(_layernorm(h, g2_ref[...], be2_ref[...], i_real), 0.0)

    # Linear(I -> E).
    h = jnp.dot(h.astype(jnp.bfloat16), w3_ref[...],
                preferred_element_type=jnp.float32) + b3_ref[...]

    # Residual + final LayerNorm(E)  (self.norm1).
    out = _layernorm(h + x, g4_ref[...], be4_ref[...], e_real)
    o_ref[...] = out.astype(o_ref.dtype)


def _feedforward_call(xp, pp, *, e_real, i_real, tm_eff, single_buffer_weights):
    M_pad, E_pad = xp.shape
    I_pad = pp["w1"].shape[1]

    if single_buffer_weights:
        # Constant-index operands: one resident copy is enough.
        full = lambda shape: pl.BlockSpec(shape, lambda i: (0, 0),
                                          pipeline_mode=pl.Buffered(1))
    else:
        full = lambda shape: pl.BlockSpec(shape, lambda i: (0, 0))

    in_specs = [
        pl.BlockSpec((tm_eff, E_pad), lambda i: (i, 0)),                  # x (streamed)
        full((E_pad, I_pad)), full((1, I_pad)), full((1, I_pad)), full((1, I_pad)),
        full((I_pad, I_pad)), full((1, I_pad)), full((1, I_pad)), full((1, I_pad)),
        full((I_pad, E_pad)), full((1, E_pad)),
        full((1, E_pad)), full((1, E_pad)),
    ]

    # VMEM budget: resident bf16 weights (+ small f32 vectors) + pipelined x/out
    # tiles + a few live f32 intermediates.  Cap at 64 MiB (v7x physical VMEM).
    weight_bytes = 2 * (E_pad * I_pad + I_pad * I_pad + I_pad * E_pad)
    vec_bytes = 4 * (6 * I_pad + 3 * E_pad)
    io_bytes = 2 * 2 * tm_eff * E_pad * 4
    act_bytes = 6 * tm_eff * I_pad * 4
    wbuf = 1 if single_buffer_weights else 2
    est = wbuf * (weight_bytes + vec_bytes) + io_bytes + act_bytes
    vmem_limit = int(min(max(2 * est, 32 * 2**20), 64 * 2**20))

    cost = pl.CostEstimate(
        flops=2 * M_pad * (2 * E_pad * I_pad + I_pad * I_pad),
        transcendentals=3 * M_pad,                    # one rsqrt per row per LayerNorm
        bytes_accessed=8 * M_pad * E_pad + weight_bytes + vec_bytes,
    )

    kernel = functools.partial(feedforward_kernel, e_real=e_real, i_real=i_real)

    return pl.pallas_call(
        kernel,
        out_shape=jax.ShapeDtypeStruct((M_pad, E_pad), xp.dtype),
        grid_spec=pltpu.PrefetchScalarGridSpec(
            num_scalar_prefetch=0,
            grid=(M_pad // tm_eff,),
            in_specs=in_specs,
            out_specs=pl.BlockSpec((tm_eff, E_pad), lambda i: (i, 0)),
        ),
        compiler_params=pltpu.CompilerParams(
            dimension_semantics=("parallel",),
            vmem_limit_bytes=vmem_limit,
        ),
        cost_estimate=cost,
    )(
        xp,
        pp["w1"], pp["b1"], pp["g1"], pp["be1"],
        pp["w2"], pp["b2"], pp["g2"], pp["be2"],
        pp["w3"], pp["b3"],
        pp["g4"], pp["be4"],
    )


def feedforward_pallas(x2d, pp, *, i_real, tm=512):
    """x2d: (M, E) f32 (unpadded). pp: padded/bf16 params from pad_and_cast_params.
    Returns (M, E) f32."""
    M, E = x2d.shape
    E_pad = pp["w1"].shape[0]

    tm_eff = min(tm, _round_up(M, 8))        # big row tiles, never larger than needed
    M_pad = _round_up(M, tm_eff)
    xp = jnp.pad(x2d, ((0, M_pad - M), (0, E_pad - E)))

    kwargs = dict(e_real=E, i_real=i_real, tm_eff=tm_eff)
    try:
        out = _feedforward_call(xp, pp, single_buffer_weights=True, **kwargs)
        jax.block_until_ready(out)
    except Exception:
        # TODO(synk): pipeline_mode=pl.Buffered(1) unsupported on this jax build;
        # fall back to default (double-buffered) weight specs.
        out = _feedforward_call(xp, pp, single_buffer_weights=False, **kwargs)

    return out[:M, :E]


def pad_and_cast_params(p, e_pad, i_pad):
    """Zero-pad features up to lane-dense sizes; cast matmul weights to bf16."""
    def pad(a, rows, cols):
        return jnp.pad(a, ((0, rows - a.shape[0]), (0, cols - a.shape[1])))
    return dict(
        w1=pad(p["w1"], e_pad, i_pad).astype(jnp.bfloat16),
        b1=pad(p["b1"], 1, i_pad), g1=pad(p["g1"], 1, i_pad), be1=pad(p["be1"], 1, i_pad),
        w2=pad(p["w2"], i_pad, i_pad).astype(jnp.bfloat16),
        b2=pad(p["b2"], 1, i_pad), g2=pad(p["g2"], 1, i_pad), be2=pad(p["be2"], 1, i_pad),
        w3=pad(p["w3"], i_pad, e_pad).astype(jnp.bfloat16),
        b3=pad(p["b3"], 1, e_pad),
        g4=pad(p["g4"], 1, e_pad), be4=pad(p["be4"], 1, e_pad),
    )


def feedforward_ref(x2d, p):
    """Pure-JAX reference (same bf16-matmul / f32-LN split as the kernel)."""
    def ln(h, g, b):
        mu = jnp.mean(h, axis=-1, keepdims=True)
        var = jnp.mean((h - mu) ** 2, axis=-1, keepdims=True)
        return (h - mu) * jax.lax.rsqrt(var + LN_EPS) * g + b

    def mm(a, w):
        return jnp.dot(a.astype(jnp.bfloat16), w.astype(jnp.bfloat16),
                       preferred_element_type=jnp.float32)

    h = mm(x2d, p["w1"]) + p["b1"]
    h = jnp.maximum(ln(h, p["g1"], p["be1"]), 0.0)
    h = mm(h, p["w2"]) + p["b2"]
    h = jnp.maximum(ln(h, p["g2"], p["be2"]), 0.0)
    h = mm(h, p["w3"]) + p["b3"]
    return ln(h + x2d, p["g4"], p["be4"])


def init_params(key, embedding_size, internal_size):
    """Deterministic init mimicking nn.Linear (uniform +-1/sqrt(fan_in)) and
    nn.LayerNorm (gamma=1, beta=0). Weights stored pre-transposed (in, out)."""
    E, I = embedding_size, internal_size
    ks = jax.random.split(key, 6)

    def lin(kw, kb, fan_in, fan_out):
        bound = 1.0 / jnp.sqrt(fan_in)
        w = jax.random.uniform(kw, (fan_in, fan_out), jnp.float32, -bound, bound)
        b = jax.random.uniform(kb, (1, fan_out), jnp.float32, -bound, bound)
        return w, b

    w1, b1 = lin(ks[0], ks[1], E, I)
    w2, b2 = lin(ks[2], ks[3], I, I)
    w3, b3 = lin(ks[4], ks[5], I, E)
    return dict(
        w1=w1, b1=b1, g1=jnp.ones((1, I), jnp.float32), be1=jnp.zeros((1, I), jnp.float32),
        w2=w2, b2=b2, g2=jnp.ones((1, I), jnp.float32), be2=jnp.zeros((1, I), jnp.float32),
        w3=w3, b3=b3,
        g4=jnp.ones((1, E), jnp.float32), be4=jnp.zeros((1, E), jnp.float32),
    )


if __name__ == "__main__":
    batch, seq = 2, 9
    embedding_size, internal_size = 100, 96   # exercises E- and I-padding to 128

    key = jax.random.PRNGKey(0)
    kx, kp = jax.random.split(key)

    x = jax.random.normal(kx, (batch, seq, embedding_size), jnp.float32)
    params = init_params(kp, embedding_size, internal_size)

    E_pad = _round_up(embedding_size, 128)
    I_pad = _round_up(internal_size, 128)
    pp = pad_and_cast_params(params, E_pad, I_pad)

    x2d = x.reshape(batch * seq, embedding_size)
    out2d = feedforward_pallas(x2d, pp, i_real=internal_size)
    out = out2d.reshape(batch, seq, embedding_size)
    jax.block_until_ready(out)

    ref = feedforward_ref(x2d, params).reshape(batch, seq, embedding_size)
    assert jnp.allclose(out, ref, atol=5e-3, rtol=5e-3), "mismatch vs JAX reference"

    print("KERNEL_OK")
</pallas_src>

<mosaic_0001>
module attributes {stable_mosaic.version = 11 : i64} {
  func.func @feedforward_kernel(%arg0: i32, %arg1: memref<24x128xf32, #tpu.memory_space<vmem>>, %arg2: memref<128x128xbf16, #tpu.memory_space<vmem>>, %arg3: memref<1x128xf32, #tpu.memory_space<vmem>>, %arg4: memref<1x128xf32, #tpu.memory_space<vmem>>, %arg5: memref<1x128xf32, #tpu.memory_space<vmem>>, %arg6: memref<128x128xbf16, #tpu.memory_space<vmem>>, %arg7: memref<1x128xf32, #tpu.memory_space<vmem>>, %arg8: memref<1x128xf32, #tpu.memory_space<vmem>>, %arg9: memref<1x128xf32, #tpu.memory_space<vmem>>, %arg10: memref<128x128xbf16, #tpu.memory_space<vmem>>, %arg11: memref<1x128xf32, #tpu.memory_space<vmem>>, %arg12: memref<1x128xf32, #tpu.memory_space<vmem>>, %arg13: memref<1x128xf32, #tpu.memory_space<vmem>>, %arg14: memref<24x128xf32, #tpu.memory_space<vmem>>) attributes {dimension_semantics = [#tpu.dimension_semantics<parallel>], iteration_bounds = array<i64: 1>, scalar_prefetch = 0 : i64, scratch_operands = 0 : i64, tpu.core_type = #tpu.core_type<tc>, window_params = [{transform_indices = @transform_0, window_bounds = array<i64: 24, 128>}, {pipeline_mode = #tpu.pipeline_mode<synchronous>, transform_indices = @transform_1, window_bounds = array<i64: 128, 128>}, {pipeline_mode = #tpu.pipeline_mode<synchronous>, transform_indices = @transform_2, window_bounds = array<i64: 1, 128>}, {pipeline_mode = #tpu.pipeline_mode<synchronous>, transform_indices = @transform_3, window_bounds = array<i64: 1, 128>}, {pipeline_mode = #tpu.pipeline_mode<synchronous>, transform_indices = @transform_4, window_bounds = array<i64: 1, 128>}, {pipeline_mode = #tpu.pipeline_mode<synchronous>, transform_indices = @transform_5, window_bounds = array<i64: 128, 128>}, {pipeline_mode = #tpu.pipeline_mode<synchronous>, transform_indices = @transform_6, window_bounds = array<i64: 1, 128>}, {pipeline_mode = #tpu.pipeline_mode<synchronous>, transform_indices = @transform_7, window_bounds = array<i64: 1, 128>}, {pipeline_mode = #tpu.pipeline_mode<synchronous>, transform_indices = @transform_8, window_bounds = array<i64: 1, 128>}, {pipeline_mode = #tpu.pipeline_mode<synchronous>, transform_indices = @transform_9, window_bounds = array<i64: 128, 128>}, {pipeline_mode = #tpu.pipeline_mode<synchronous>, transform_indices = @transform_10, window_bounds = array<i64: 1, 128>}, {pipeline_mode = #tpu.pipeline_mode<synchronous>, transform_indices = @transform_11, window_bounds = array<i64: 1, 128>}, {pipeline_mode = #tpu.pipeline_mode<synchronous>, transform_indices = @transform_12, window_bounds = array<i64: 1, 128>}, {transform_indices = @transform_13, window_bounds = array<i64: 24, 128>}]} {
    %c0 = arith.constant 0 : index
    %c0_0 = arith.constant 0 : index
    %0 = vector.load %arg1[%c0, %c0_0] : memref<24x128xf32, #tpu.memory_space<vmem>>, vector<24x128xf32>
    %1 = arith.truncf %0 : vector<24x128xf32> to vector<24x128xbf16>
    %c0_1 = arith.constant 0 : index
    %c0_2 = arith.constant 0 : index
    %2 = vector.load %arg2[%c0_1, %c0_2] : memref<128x128xbf16, #tpu.memory_space<vmem>>, vector<128x128xbf16>
    %cst = arith.constant dense<0.000000e+00> : vector<24x128xf32>
    %3 = tpu.matmul %1, %2, %cst {dimension_numbers = #tpu.dot_dimension_numbers<[1], [0], [0], [1], [0, 0, 1, 1], [], []>} : vector<24x128xbf16>, vector<128x128xbf16>, vector<24x128xf32> -> vector<24x128xf32>
    %c0_3 = arith.constant 0 : index
    %c0_4 = arith.constant 0 : index
    %4 = vector.load %arg3[%c0_3, %c0_4] : memref<1x128xf32, #tpu.memory_space<vmem>>, vector<1x128xf32>
    %5 = vector.broadcast %4 : vector<1x128xf32> to vector<24x128xf32>
    %6 = arith.addf %3, %5 : vector<24x128xf32>
    %c0_5 = arith.constant 0 : index
    %c0_6 = arith.constant 0 : index
    %7 = vector.load %arg4[%c0_5, %c0_6] : memref<1x128xf32, #tpu.memory_space<vmem>>, vector<1x128xf32>
    %c0_7 = arith.constant 0 : index
    %c0_8 = arith.constant 0 : index
    %8 = vector.load %arg5[%c0_7, %c0_8] : memref<1x128xf32, #tpu.memory_space<vmem>>, vector<1x128xf32>
    %cst_9 = arith.constant dense<0.000000e+00> : vector<24xf32>
    %9 = vector.multi_reduction <add>, %6, %cst_9 [1] : vector<24x128xf32> to vector<24xf32>
    %10 = vector.shape_cast %9 : vector<24xf32> to vector<24x1xf32>
    %11 = arith.mulf %6, %6 : vector<24x128xf32>
    %cst_10 = arith.constant dense<0.000000e+00> : vector<24xf32>
    %12 = vector.multi_reduction <add>, %11, %cst_10 [1] : vector<24x128xf32> to vector<24xf32>
    %13 = vector.shape_cast %12 : vector<24xf32> to vector<24x1xf32>
    %cst_11 = arith.constant 0.010416667 : f32
    %14 = vector.broadcast %cst_11 : f32 to vector<24x1xf32>
    %15 = arith.mulf %10, %14 : vector<24x1xf32>
    %cst_12 = arith.constant 0.010416667 : f32
    %16 = vector.broadcast %cst_12 : f32 to vector<24x1xf32>
    %17 = arith.mulf %13, %16 : vector<24x1xf32>
    %18 = arith.mulf %15, %15 : vector<24x1xf32>
    %19 = arith.subf %17, %18 : vector<24x1xf32>
    %cst_13 = arith.constant 0.000000e+00 : f32
    %20 = vector.broadcast %cst_13 : f32 to vector<24x1xf32>
    %21 = arith.maximumf %19, %20 : vector<24x1xf32>
    %22 = vector.broadcast %15 : vector<24x1xf32> to vector<24x128xf32>
    %23 = arith.subf %6, %22 : vector<24x128xf32>
    %cst_14 = arith.constant 9.99999974E-6 : f32
    %24 = vector.broadcast %cst_14 : f32 to vector<24x1xf32>
    %25 = arith.addf %21, %24 : vector<24x1xf32>
    %26 = math.rsqrt %25 : vector<24x1xf32>
    %27 = vector.broadcast %26 : vector<24x1xf32> to vector<24x128xf32>
    %28 = arith.mulf %23, %27 : vector<24x128xf32>
    %29 = vector.broadcast %7 : vector<1x128xf32> to vector<24x128xf32>
    %30 = arith.mulf %28, %29 : vector<24x128xf32>
    %31 = vector.broadcast %8 : vector<1x128xf32> to vector<24x128xf32>
    %32 = arith.addf %30, %31 : vector<24x128xf32>
    %cst_15 = arith.constant 0.000000e+00 : f32
    %33 = vector.broadcast %cst_15 : f32 to vector<24x128xf32>
    %34 = arith.maximumf %32, %33 : vector<24x128xf32>
    %35 = arith.truncf %34 : vector<24x128xf32> to vector<24x128xbf16>
    %c0_16 = arith.constant 0 : index
    %c0_17 = arith.constant 0 : index
    %36 = vector.load %arg6[%c0_16, %c0_17] : memref<128x128xbf16, #tpu.memory_space<vmem>>, vector<128x128xbf16>
    %cst_18 = arith.constant dense<0.000000e+00> : vector<24x128xf32>
    %37 = tpu.matmul %35, %36, %cst_18 {dimension_numbers = #tpu.dot_dimension_numbers<[1], [0], [0], [1], [0, 0, 1, 1], [], []>} : vector<24x128xbf16>, vector<128x128xbf16>, vector<24x128xf32> -> vector<24x128xf32>
    %c0_19 = arith.constant 0 : index
    %c0_20 = arith.constant 0 : index
    %38 = vector.load %arg7[%c0_19, %c0_20] : memref<1x128xf32, #tpu.memory_space<vmem>>, vector<1x128xf32>
    %39 = vector.broadcast %38 : vector<1x128xf32> to vector<24x128xf32>
    %40 = arith.addf %37, %39 : vector<24x128xf32>
    %c0_21 = arith.constant 0 : index
    %c0_22 = arith.constant 0 : index
    %41 = vector.load %arg8[%c0_21, %c0_22] : memref<1x128xf32, #tpu.memory_space<vmem>>, vector<1x128xf32>
    %c0_23 = arith.constant 0 : index
    %c0_24 = arith.constant 0 : index
    %42 = vector.load %arg9[%c0_23, %c0_24] : memref<1x128xf32, #tpu.memory_space<vmem>>, vector<1x128xf32>
    %cst_25 = arith.constant dense<0.000000e+00> : vector<24xf32>
    %43 = vector.multi_reduction <add>, %40, %cst_25 [1] : vector<24x128xf32> to vector<24xf32>
    %44 = vector.shape_cast %43 : vector<24xf32> to vector<24x1xf32>
    %45 = arith.mulf %40, %40 : vector<24x128xf32>
    %cst_26 = arith.constant dense<0.000000e+00> : vector<24xf32>
    %46 = vector.multi_reduction <add>, %45, %cst_26 [1] : vector<24x128xf32> to vector<24xf32>
    %47 = vector.shape_cast %46 : vector<24xf32> to vector<24x1xf32>
    %cst_27 = arith.constant 0.010416667 : f32
    %48 = vector.broadcast %cst_27 : f32 to vector<24x1xf32>
    %49 = arith.mulf %44, %48 : vector<24x1xf32>
    %cst_28 = arith.constant 0.010416667 : f32
    %50 = vector.broadcast %cst_28 : f32 to vector<24x1xf32>
    %51 = arith.mulf %47, %50 : vector<24x1xf32>
    %52 = arith.mulf %49, %49 : vector<24x1xf32>
    %53 = arith.subf %51, %52 : vector<24x1xf32>
    %cst_29 = arith.constant 0.000000e+00 : f32
    %54 = vector.broadcast %cst_29 : f32 to vector<24x1xf32>
    %55 = arith.maximumf %53, %54 : vector<24x1xf32>
    %56 = vector.broadcast %49 : vector<24x1xf32> to vector<24x128xf32>
    %57 = arith.subf %40, %56 : vector<24x128xf32>
    %cst_30 = arith.constant 9.99999974E-6 : f32
    %58 = vector.broadcast %cst_30 : f32 to vector<24x1xf32>
    %59 = arith.addf %55, %58 : vector<24x1xf32>
    %60 = math.rsqrt %59 : vector<24x1xf32>
    %61 = vector.broadcast %60 : vector<24x1xf32> to vector<24x128xf32>
    %62 = arith.mulf %57, %61 : vector<24x128xf32>
    %63 = vector.broadcast %41 : vector<1x128xf32> to vector<24x128xf32>
    %64 = arith.mulf %62, %63 : vector<24x128xf32>
    %65 = vector.broadcast %42 : vector<1x128xf32> to vector<24x128xf32>
    %66 = arith.addf %64, %65 : vector<24x128xf32>
    %cst_31 = arith.constant 0.000000e+00 : f32
    %67 = vector.broadcast %cst_31 : f32 to vector<24x128xf32>
    %68 = arith.maximumf %66, %67 : vector<24x128xf32>
    %69 = arith.truncf %68 : vector<24x128xf32> to vector<24x128xbf16>
    %c0_32 = arith.constant 0 : index
    %c0_33 = arith.constant 0 : index
    %70 = vector.load %arg10[%c0_32, %c0_33] : memref<128x128xbf16, #tpu.memory_space<vmem>>, vector<128x128xbf16>
    %cst_34 = arith.constant dense<0.000000e+00> : vector<24x128xf32>
    %71 = tpu.matmul %69, %70, %cst_34 {dimension_numbers = #tpu.dot_dimension_numbers<[1], [0], [0], [1], [0, 0, 1, 1], [], []>} : vector<24x128xbf16>, vector<128x128xbf16>, vector<24x128xf32> -> vector<24x128xf32>
    %c0_35 = arith.constant 0 : index
    %c0_36 = arith.constant 0 : index
    %72 = vector.load %arg11[%c0_35, %c0_36] : memref<1x128xf32, #tpu.memory_space<vmem>>, vector<1x128xf32>
    %73 = vector.broadcast %72 : vector<1x128xf32> to vector<24x128xf32>
    %74 = arith.addf %71, %73 : vector<24x128xf32>
    %75 = arith.addf %74, %0 : vector<24x128xf32>
    %c0_37 = arith.constant 0 : index
    %c0_38 = arith.constant 0 : index
    %76 = vector.load %arg12[%c0_37, %c0_38] : memref<1x128xf32, #tpu.memory_space<vmem>>, vector<1x128xf32>
    %c0_39 = arith.constant 0 : index
    %c0_40 = arith.constant 0 : index
    %77 = vector.load %arg13[%c0_39, %c0_40] : memref<1x128xf32, #tpu.memory_space<vmem>>, vector<1x128xf32>
    %cst_41 = arith.constant dense<0.000000e+00> : vector<24xf32>
    %78 = vector.multi_reduction <add>, %75, %cst_41 [1] : vector<24x128xf32> to vector<24xf32>
    %79 = vector.shape_cast %78 : vector<24xf32> to vector<24x1xf32>
    %80 = arith.mulf %75, %75 : vector<24x128xf32>
    %cst_42 = arith.constant dense<0.000000e+00> : vector<24xf32>
    %81 = vector.multi_reduction <add>, %80, %cst_42 [1] : vector<24x128xf32> to vector<24xf32>
    %82 = vector.shape_cast %81 : vector<24xf32> to vector<24x1xf32>
    %cst_43 = arith.constant 0.00999999977 : f32
    %83 = vector.broadcast %cst_43 : f32 to vector<24x1xf32>
    %84 = arith.mulf %79, %83 : vector<24x1xf32>
    %cst_44 = arith.constant 0.00999999977 : f32
    %85 = vector.broadcast %cst_44 : f32 to vector<24x1xf32>
    %86 = arith.mulf %82, %85 : vector<24x1xf32>
    %87 = arith.mulf %84, %84 : vector<24x1xf32>
    %88 = arith.subf %86, %87 : vector<24x1xf32>
    %cst_45 = arith.constant 0.000000e+00 : f32
    %89 = vector.broadcast %cst_45 : f32 to vector<24x1xf32>
    %90 = arith.maximumf %88, %89 : vector<24x1xf32>
    %91 = vector.broadcast %84 : vector<24x1xf32> to vector<24x128xf32>
    %92 = arith.subf %75, %91 : vector<24x128xf32>
    %cst_46 = arith.constant 9.99999974E-6 : f32
    %93 = vector.broadcast %cst_46 : f32 to vector<24x1xf32>
    %94 = arith.addf %90, %93 : vector<24x1xf32>
    %95 = math.rsqrt %94 : vector<24x1xf32>
    %96 = vector.broadcast %95 : vector<24x1xf32> to vector<24x128xf32>
    %97 = arith.mulf %92, %96 : vector<24x128xf32>
    %98 = vector.broadcast %76 : vector<1x128xf32> to vector<24x128xf32>
    %99 = arith.mulf %97, %98 : vector<24x128xf32>
    %100 = vector.broadcast %77 : vector<1x128xf32> to vector<24x128xf32>
    %101 = arith.addf %99, %100 : vector<24x128xf32>
    %c0_47 = arith.constant 0 : index
    %c0_48 = arith.constant 0 : index
    %102 = vector.load %arg14[%c0_47, %c0_48] : memref<24x128xf32, #tpu.memory_space<vmem>>, vector<24x128xf32>
    tpu.vector_store %arg14[%c0_47, %c0_48], %101 {strides = array<i32>} : memref<24x128xf32, #tpu.memory_space<vmem>>, vector<24x128xf32>,
    return
  }
  func.func @transform_0(%arg0: i32) -> (i32, i32) {
    %c0_i32 = arith.constant 0 : i32
    %c0_i32_0 = arith.constant 0 : i32
    return %arg0, %c0_i32 : i32, i32
  }
  func.func @transform_1(%arg0: i32) -> (i32, i32) {
    %c0_i32 = arith.constant 0 : i32
    %c0_i32_0 = arith.constant 0 : i32
    %c0_i32_1 = arith.constant 0 : i32
    return %c0_i32, %c0_i32_0 : i32, i32
  }
  func.func @transform_2(%arg0: i32) -> (i32, i32) {
    %c0_i32 = arith.constant 0 : i32
    %c0_i32_0 = arith.constant 0 : i32
    %c0_i32_1 = arith.constant 0 : i32
    return %c0_i32, %c0_i32_0 : i32, i32
  }
  func.func @transform_3(%arg0: i32) -> (i32, i32) {
    %c0_i32 = arith.constant 0 : i32
    %c0_i32_0 = arith.constant 0 : i32
    %c0_i32_1 = arith.constant 0 : i32
    return %c0_i32, %c0_i32_0 : i32, i32
  }
  func.func @transform_4(%arg0: i32) -> (i32, i32) {
    %c0_i32 = arith.constant 0 : i32
    %c0_i32_0 = arith.constant 0 : i32
    %c0_i32_1 = arith.constant 0 : i32
    return %c0_i32, %c0_i32_0 : i32, i32
  }
  func.func @transform_5(%arg0: i32) -> (i32, i32) {
    %c0_i32 = arith.constant 0 : i32
    %c0_i32_0 = arith.constant 0 : i32
    %c0_i32_1 = arith.constant 0 : i32
    return %c0_i32, %c0_i32_0 : i32, i32
  }
  func.func @transform_6(%arg0: i32) -> (i32, i32) {
    %c0_i32 = arith.constant 0 : i32
    %c0_i32_0 = arith.constant 0 : i32
    %c0_i32_1 = arith.constant 0 : i32
    return %c0_i32, %c0_i32_0 : i32, i32
  }
  func.func @transform_7(%arg0: i32) -> (i32, i32) {
    %c0_i32 = arith.constant 0 : i32
    %c0_i32_0 = arith.constant 0 : i32
    %c0_i32_1 = arith.constant 0 : i32
    return %c0_i32, %c0_i32_0 : i32, i32
  }
  func.func @transform_8(%arg0: i32) -> (i32, i32) {
    %c0_i32 = arith.constant 0 : i32
    %c0_i32_0 = arith.constant 0 : i32
    %c0_i32_1 = arith.constant 0 : i32
    return %c0_i32, %c0_i32_0 : i32, i32
  }
  func.func @transform_9(%arg0: i32) -> (i32, i32) {
    %c0_i32 = arith.constant 0 : i32
    %c0_i32_0 = arith.constant 0 : i32
    %c0_i32_1 = arith.constant 0 : i32
    return %c0_i32, %c0_i32_0 : i32, i32
  }
  func.func @transform_10(%arg0: i32) -> (i32, i32) {
    %c0_i32 = arith.constant 0 : i32
    %c0_i32_0 = arith.constant 0 : i32
    %c0_i32_1 = arith.constant 0 : i32
    return %c0_i32, %c0_i32_0 : i32, i32
  }
  func.func @transform_11(%arg0: i32) -> (i32, i32) {
    %c0_i32 = arith.constant 0 : i32
    %c0_i32_0 = arith.constant 0 : i32
    %c0_i32_1 = arith.constant 0 : i32
    return %c0_i32, %c0_i32_0 : i32, i32
  }
  func.func @transform_12(%arg0: i32) -> (i32, i32) {
    %c0_i32 = arith.constant 0 : i32
    %c0_i32_0 = arith.constant 0 : i32
    %c0_i32_1 = arith.constant 0 : i32
    return %c0_i32, %c0_i32_0 : i32, i32
  }
  func.func @transform_13(%arg0: i32) -> (i32, i32) {
    %c0_i32 = arith.constant 0 : i32
    %c0_i32_0 = arith.constant 0 : i32
    return %arg0, %c0_i32 : i32, i32
  }
}

module attributes {stable_mosaic.version = 11 : i64} {
  func.func @feedforward_kernel(%arg0: i32, %arg1: memref<24x128xf32, #tpu.memory_space<vmem>>, %arg2: memref<128x128xbf16, #tpu.memory_space<vmem>>, %arg3: memref<1x128xf32, #tpu.memory_space<vmem>>, %arg4: memref<1x128xf32, #tpu.memory_space<vmem>>, %arg5: memref<1x128xf32, #tpu.memory_space<vmem>>, %arg6: memref<128x128xbf16, #tpu.memory_space<vmem>>, %arg7: memref<1x128xf32, #tpu.memory_space<vmem>>, %arg8: memref<1x128xf32, #tpu.memory_space<vmem>>, %arg9: memref<1x128xf32, #tpu.memory_space<vmem>>, %arg10: memref<128x128xbf16, #tpu.memory_space<vmem>>, %arg11: memref<1x128xf32, #tpu.memory_space<vmem>>, %arg12: memref<1x128xf32, #tpu.memory_space<vmem>>, %arg13: memref<1x128xf32, #tpu.memory_space<vmem>>, %arg14: memref<24x128xf32, #tpu.memory_space<vmem>>) attributes {dimension_semantics = [#tpu.dimension_semantics<parallel>], iteration_bounds = array<i64: 1>, scalar_prefetch = 0 : i64, scratch_operands = 0 : i64, tpu.core_type = #tpu.core_type<tc>, window_params = [{transform_indices = @transform_0, window_bounds = array<i64: 24, 128>}, {pipeline_mode = #tpu.pipeline_mode<synchronous>, transform_indices = @transform_1, window_bounds = array<i64: 128, 128>}, {pipeline_mode = #tpu.pipeline_mode<synchronous>, transform_indices = @transform_2, window_bounds = array<i64: 1, 128>}, {pipeline_mode = #tpu.pipeline_mode<synchronous>, transform_indices = @transform_3, window_bounds = array<i64: 1, 128>}, {pipeline_mode = #tpu.pipeline_mode<synchronous>, transform_indices = @transform_4, window_bounds = array<i64: 1, 128>}, {pipeline_mode = #tpu.pipeline_mode<synchronous>, transform_indices = @transform_5, window_bounds = array<i64: 128, 128>}, {pipeline_mode = #tpu.pipeline_mode<synchronous>, transform_indices = @transform_6, window_bounds = array<i64: 1, 128>}, {pipeline_mode = #tpu.pipeline_mode<synchronous>, transform_indices = @transform_7, window_bounds = array<i64: 1, 128>}, {pipeline_mode = #tpu.pipeline_mode<synchronous>, transform_indices = @transform_8, window_bounds = array<i64: 1, 128>}, {pipeline_mode = #tpu.pipeline_mode<synchronous>, transform_indices = @transform_9, window_bounds = array<i64: 128, 128>}, {pipeline_mode = #tpu.pipeline_mode<synchronous>, transform_indices = @transform_10, window_bounds = array<i64: 1, 128>}, {pipeline_mode = #tpu.pipeline_mode<synchronous>, transform_indices = @transform_11, window_bounds = array<i64: 1, 128>}, {pipeline_mode = #tpu.pipeline_mode<synchronous>, transform_indices = @transform_12, window_bounds = array<i64: 1, 128>}, {transform_indices = @transform_13, window_bounds = array<i64: 24, 128>}]} {
    %c0 = arith.constant 0 : index
    %c0_0 = arith.constant 0 : index
    %0 = vector.load %arg1[%c0, %c0_0] : memref<24x128xf32, #tpu.memory_space<vmem>>, vector<24x128xf32>
    %1 = arith.truncf %0 : vector<24x128xf32> to vector<24x128xbf16>
    %c0_1 = arith.constant 0 : index
    %c0_2 = arith.constant 0 : index
    %2 = vector.load %arg2[%c0_1, %c0_2] : memref<128x128xbf16, #tpu.memory_space<vmem>>, vector<128x128xbf16>
    %cst = arith.constant dense<0.000000e+00> : vector<24x128xf32>
    %3 = tpu.matmul %1, %2, %cst {dimension_numbers = #tpu.dot_dimension_numbers<[1], [0], [0], [1], [0, 0, 1, 1], [], []>} : vector<24x128xbf16>, vector<128x128xbf16>, vector<24x128xf32> -> vector<24x128xf32>
    %c0_3 = arith.constant 0 : index
    %c0_4 = arith.constant 0 : index
    %4 = vector.load %arg3[%c0_3, %c0_4] : memref<1x128xf32, #tpu.memory_space<vmem>>, vector<1x128xf32>
    %5 = vector.broadcast %4 : vector<1x128xf32> to vector<24x128xf32>
    %6 = arith.addf %3, %5 : vector<24x128xf32>
    %c0_5 = arith.constant 0 : index
    %c0_6 = arith.constant 0 : index
    %7 = vector.load %arg4[%c0_5, %c0_6] : memref<1x128xf32, #tpu.memory_space<vmem>>, vector<1x128xf32>
    %c0_7 = arith.constant 0 : index
    %c0_8 = arith.constant 0 : index
    %8 = vector.load %arg5[%c0_7, %c0_8] : memref<1x128xf32, #tpu.memory_space<vmem>>, vector<1x128xf32>
    %cst_9 = arith.constant dense<0.000000e+00> : vector<24xf32>
    %9 = vector.multi_reduction <add>, %6, %cst_9 [1] : vector<24x128xf32> to vector<24xf32>
    %10 = vector.shape_cast %9 : vector<24xf32> to vector<24x1xf32>
    %11 = arith.mulf %6, %6 : vector<24x128xf32>
    %cst_10 = arith.constant dense<0.000000e+00> : vector<24xf32>
    %12 = vector.multi_reduction <add>, %11, %cst_10 [1] : vector<24x128xf32> to vector<24xf32>
    %13 = vector.shape_cast %12 : vector<24xf32> to vector<24x1xf32>
    %cst_11 = arith.constant 0.010416667 : f32
    %14 = vector.broadcast %cst_11 : f32 to vector<24x1xf32>
    %15 = arith.mulf %10, %14 : vector<24x1xf32>
    %cst_12 = arith.constant 0.010416667 : f32
    %16 = vector.broadcast %cst_12 : f32 to vector<24x1xf32>
    %17 = arith.mulf %13, %16 : vector<24x1xf32>
    %18 = arith.mulf %15, %15 : vector<24x1xf32>
    %19 = arith.subf %17, %18 : vector<24x1xf32>
    %cst_13 = arith.constant 0.000000e+00 : f32
    %20 = vector.broadcast %cst_13 : f32 to vector<24x1xf32>
    %21 = arith.maximumf %19, %20 : vector<24x1xf32>
    %22 = vector.broadcast %15 : vector<24x1xf32> to vector<24x128xf32>
    %23 = arith.subf %6, %22 : vector<24x128xf32>
    %cst_14 = arith.constant 9.99999974E-6 : f32
    %24 = vector.broadcast %cst_14 : f32 to vector<24x1xf32>
    %25 = arith.addf %21, %24 : vector<24x1xf32>
    %26 = math.rsqrt %25 : vector<24x1xf32>
    %27 = vector.broadcast %26 : vector<24x1xf32> to vector<24x128xf32>
    %28 = arith.mulf %23, %27 : vector<24x128xf32>
    %29 = vector.broadcast %7 : vector<1x128xf32> to vector<24x128xf32>
    %30 = arith.mulf %28, %29 : vector<24x128xf32>
    %31 = vector.broadcast %8 : vector<1x128xf32> to vector<24x128xf32>
    %32 = arith.addf %30, %31 : vector<24x128xf32>
    %cst_15 = arith.constant 0.000000e+00 : f32
    %33 = vector.broadcast %cst_15 : f32 to vector<24x128xf32>
    %34 = arith.maximumf %32, %33 : vector<24x128xf32>
    %35 = arith.truncf %34 : vector<24x128xf32> to vector<24x128xbf16>
    %c0_16 = arith.constant 0 : index
    %c0_17 = arith.constant 0 : index
    %36 = vector.load %arg6[%c0_16, %c0_17] : memref<128x128xbf16, #tpu.memory_space<vmem>>, vector<128x128xbf16>
    %cst_18 = arith.constant dense<0.000000e+00> : vector<24x128xf32>
    %37 = tpu.matmul %35, %36, %cst_18 {dimension_numbers = #tpu.dot_dimension_numbers<[1], [0], [0], [1], [0, 0, 1, 1], [], []>} : vector<24x128xbf16>, vector<128x128xbf16>, vector<24x128xf32> -> vector<24x128xf32>
    %c0_19 = arith.constant 0 : index
    %c0_20 = arith.constant 0 : index
    %38 = vector.load %arg7[%c0_19, %c0_20] : memref<1x128xf32, #tpu.memory_space<vmem>>, vector<1x128xf32>
    %39 = vector.broadcast %38 : vector<1x128xf32> to vector<24x128xf32>
    %40 = arith.addf %37, %39 : vector<24x128xf32>
    %c0_21 = arith.constant 0 : index
    %c0_22 = arith.constant 0 : index
    %41 = vector.load %arg8[%c0_21, %c0_22] : memref<1x128xf32, #tpu.memory_space<vmem>>, vector<1x128xf32>
    %c0_23 = arith.constant 0 : index
    %c0_24 = arith.constant 0 : index
    %42 = vector.load %arg9[%c0_23, %c0_24] : memref<1x128xf32, #tpu.memory_space<vmem>>, vector<1x128xf32>
    %cst_25 = arith.constant dense<0.000000e+00> : vector<24xf32>
    %43 = vector.multi_reduction <add>, %40, %cst_25 [1] : vector<24x128xf32> to vector<24xf32>
    %44 = vector.shape_cast %43 : vector<24xf32> to vector<24x1xf32>
    %45 = arith.mulf %40, %40 : vector<24x128xf32>
    %cst_26 = arith.constant dense<0.000000e+00> : vector<24xf32>
    %46 = vector.multi_reduction <add>, %45, %cst_26 [1] : vector<24x128xf32> to vector<24xf32>
    %47 = vector.shape_cast %46 : vector<24xf32> to vector<24x1xf32>
    %cst_27 = arith.constant 0.010416667 : f32
    %48 = vector.broadcast %cst_27 : f32 to vector<24x1xf32>
    %49 = arith.mulf %44, %48 : vector<24x1xf32>
    %cst_28 = arith.constant 0.010416667 : f32
    %50 = vector.broadcast %cst_28 : f32 to vector<24x1xf32>
    %51 = arith.mulf %47, %50 : vector<24x1xf32>
    %52 = arith.mulf %49, %49 : vector<24x1xf32>
    %53 = arith.subf %51, %52 : vector<24x1xf32>
    %cst_29 = arith.constant 0.000000e+00 : f32
    %54 = vector.broadcast %cst_29 : f32 to vector<24x1xf32>
    %55 = arith.maximumf %53, %54 : vector<24x1xf32>
    %56 = vector.broadcast %49 : vector<24x1xf32> to vector<24x128xf32>
    %57 = arith.subf %40, %56 : vector<24x128xf32>
    %cst_30 = arith.constant 9.99999974E-6 : f32
    %58 = vector.broadcast %cst_30 : f32 to vector<24x1xf32>
    %59 = arith.addf %55, %58 : vector<24x1xf32>
    %60 = math.rsqrt %59 : vector<24x1xf32>
    %61 = vector.broadcast %60 : vector<24x1xf32> to vector<24x128xf32>
    %62 = arith.mulf %57, %61 : vector<24x128xf32>
    %63 = vector.broadcast %41 : vector<1x128xf32> to vector<24x128xf32>
    %64 = arith.mulf %62, %63 : vector<24x128xf32>
    %65 = vector.broadcast %42 : vector<1x128xf32> to vector<24x128xf32>
    %66 = arith.addf %64, %65 : vector<24x128xf32>
    %cst_31 = arith.constant 0.000000e+00 : f32
    %67 = vector.broadcast %cst_31 : f32 to vector<24x128xf32>
    %68 = arith.maximumf %66, %67 : vector<24x128xf32>
    %69 = arith.truncf %68 : vector<24x128xf32> to vector<24x128xbf16>
    %c0_32 = arith.constant 0 : index
    %c0_33 = arith.constant 0 : index
    %70 = vector.load %arg10[%c0_32, %c0_33] : memref<128x128xbf16, #tpu.memory_space<vmem>>, vector<128x128xbf16>
    %cst_34 = arith.constant dense<0.000000e+00> : vector<24x128xf32>
    %71 = tpu.matmul %69, %70, %cst_34 {dimension_numbers = #tpu.dot_dimension_numbers<[1], [0], [0], [1], [0, 0, 1, 1], [], []>} : vector<24x128xbf16>, vector<128x128xbf16>, vector<24x128xf32> -> vector<24x128xf32>
    %c0_35 = arith.constant 0 : index
    %c0_36 = arith.constant 0 : index
    %72 = vector.load %arg11[%c0_35, %c0_36] : memref<1x128xf32, #tpu.memory_space<vmem>>, vector<1x128xf32>
    %73 = vector.broadcast %72 : vector<1x128xf32> to vector<24x128xf32>
    %74 = arith.addf %71, %73 : vector<24x128xf32>
    %75 = arith.addf %74, %0 : vector<24x128xf32>
    %c0_37 = arith.constant 0 : index
    %c0_38 = arith.constant 0 : index
    %76 = vector.load %arg12[%c0_37, %c0_38] : memref<1x128xf32, #tpu.memory_space<vmem>>, vector<1x128xf32>
    %c0_39 = arith.constant 0 : index
    %c0_40 = arith.constant 0 : index
    %77 = vector.load %arg13[%c0_39, %c0_40] : memref<1x128xf32, #tpu.memory_space<vmem>>, vector<1x128xf32>
    %cst_41 = arith.constant dense<0.000000e+00> : vector<24xf32>
    %78 = vector.multi_reduction <add>, %75, %cst_41 [1] : vector<24x128xf32> to vector<24xf32>
    %79 = vector.shape_cast %78 : vector<24xf32> to vector<24x1xf32>
    %80 = arith.mulf %75, %75 : vector<24x128xf32>
    %cst_42 = arith.constant dense<0.000000e+00> : vector<24xf32>
    %81 = vector.multi_reduction <add>, %80, %cst_42 [1] : vector<24x128xf32> to vector<24xf32>
    %82 = vector.shape_cast %81 : vector<24xf32> to vector<24x1xf32>
    %cst_43 = arith.constant 0.00999999977 : f32
    %83 = vector.broadcast %cst_43 : f32 to vector<24x1xf32>
    %84 = arith.mulf %79, %83 : vector<24x1xf32>
    %cst_44 = arith.constant 0.00999999977 : f32
    %85 = vector.broadcast %cst_44 : f32 to vector<24x1xf32>
    %86 = arith.mulf %82, %85 : vector<24x1xf32>
    %87 = arith.mulf %84, %84 : vector<24x1xf32>
    %88 = arith.subf %86, %87 : vector<24x1xf32>
    %cst_45 = arith.constant 0.000000e+00 : f32
    %89 = vector.broadcast %cst_45 : f32 to vector<24x1xf32>
    %90 = arith.maximumf %88, %89 : vector<24x1xf32>
    %91 = vector.broadcast %84 : vector<24x1xf32> to vector<24x128xf32>
    %92 = arith.subf %75, %91 : vector<24x128xf32>
    %cst_46 = arith.constant 9.99999974E-6 : f32
    %93 = vector.broadcast %cst_46 : f32 to vector<24x1xf32>
    %94 = arith.addf %90, %93 : vector<24x1xf32>
    %95 = math.rsqrt %94 : vector<24x1xf32>
    %96 = vector.broadcast %95 : vector<24x1xf32> to vector<24x128xf32>
    %97 = arith.mulf %92, %96 : vector<24x128xf32>
    %98 = vector.broadcast %76 : vector<1x128xf32> to vector<24x128xf32>
    %99 = arith.mulf %97, %98 : vector<24x128xf32>
    %100 = vector.broadcast %77 : vector<1x128xf32> to vector<24x128xf32>
    %101 = arith.addf %99, %100 : vector<24x128xf32>
    %c0_47 = arith.constant 0 : index
    %c0_48 = arith.constant 0 : index
    %102 = vector.load %arg14[%c0_47, %c0_48] : memref<24x128xf32, #tpu.memory_space<vmem>>, vector<24x128xf32>
    tpu.vector_store %arg14[%c0_47, %c0_48], %101 {strides = array<i32>} : memref<24x128xf32, #tpu.memory_space<vmem>>, vector<24x128xf32>,
    return
  }
  func.func @transform_0(%arg0: i32) -> (i32, i32) {
    %c0_i32 = arith.constant 0 : i32
    %c0_i32_0 = arith.constant 0 : i32
    return %arg0, %c0_i32 : i32, i32
  }
  func.func @transform_1(%arg0: i32) -> (i32, i32) {
    %c0_i32 = arith.constant 0 : i32
    %c0_i32_0 = arith.constant 0 : i32
    %c0_i32_1 = arith.constant 0 : i32
    return %c0_i32, %c0_i32_0 : i32, i32
  }
  func.func @transform_2(%arg0: i32) -> (i32, i32) {
    %c0_i32 = arith.constant 0 : i32
    %c0_i32_0 = arith.constant 0 : i32
    %c0_i32_1 = arith.constant 0 : i32
    return %c0_i32, %c0_i32_0 : i32, i32
  }
  func.func @transform_3(%arg0: i32) -> (i32, i32) {
    %c0_i32 = arith.constant 0 : i32
    %c0_i32_0 = arith.constant 0 : i32
    %c0_i32_1 = arith.constant 0 : i32
    return %c0_i32, %c0_i32_0 : i32, i32
  }
  func.func @transform_4(%arg0: i32) -> (i32, i32) {
    %c0_i32 = arith.constant 0 : i32
    %c0_i32_0 = arith.constant 0 : i32
    %c0_i32_1 = arith.constant 0 : i32
    return %c0_i32, %c0_i32_0 : i32, i32
  }
  func.func @transform_5(%arg0: i32) -> (i32, i32) {
    %c0_i32 = arith.constant 0 : i32
    %c0_i32_0 = arith.constant 0 : i32
    %c0_i32_1 = arith.constant 0 : i32
    return %c0_i32, %c0_i32_0 : i32, i32
  }
  func.func @transform_6(%arg0: i32) -> (i32, i32) {
    %c0_i32 = arith.constant 0 : i32
    %c0_i32_0 = arith.constant 0 : i32
    %c0_i32_1 = arith.constant 0 : i32
    return %c0_i32, %c0_i32_0 : i32, i32
  }
  func.func @transform_7(%arg0: i32) -> (i32, i32) {
    %c0_i32 = arith.constant 0 : i32
    %c0_i32_0 = arith.constant 0 : i32
    %c0_i32_1 = arith.constant 0 : i32
    return %c0_i32, %c0_i32_0 : i32, i32
  }
  func.func @transform_8(%arg0: i32) -> (i32, i32) {
    %c0_i32 = arith.constant 0 : i32
    %c0_i32_0 = arith.constant 0 : i32
    %c0_i32_1 = arith.constant 0 : i32
    return %c0_i32, %c0_i32_0 : i32, i32
  }
  func.func @transform_9(%arg0: i32) -> (i32, i32) {
    %c0_i32 = arith.constant 0 : i32
    %c0_i32_0 = arith.constant 0 : i32
    %c0_i32_1 = arith.constant 0 : i32
    return %c0_i32, %c0_i32_0 : i32, i32
  }
  func.func @transform_10(%arg0: i32) -> (i32, i32) {
    %c0_i32 = arith.constant 0 : i32
    %c0_i32_0 = arith.constant 0 : i32
    %c0_i32_1 = arith.constant 0 : i32
    return %c0_i32, %c0_i32_0 : i32, i32
  }
  func.func @transform_11(%arg0: i32) -> (i32, i32) {
    %c0_i32 = arith.constant 0 : i32
    %c0_i32_0 = arith.constant 0 : i32
    %c0_i32_1 = arith.constant 0 : i32
    return %c0_i32, %c0_i32_0 : i32, i32
  }
  func.func @transform_12(%arg0: i32) -> (i32, i32) {
    %c0_i32 = arith.constant 0 : i32
    %c0_i32_0 = arith.constant 0 : i32
    %c0_i32_1 = arith.constant 0 : i32
    return %c0_i32, %c0_i32_0 : i32, i32
  }
  func.func @transform_13(%arg0: i32) -> (i32, i32) {
    %c0_i32 = arith.constant 0 : i32
    %c0_i32_0 = arith.constant 0 : i32
    return %arg0, %c0_i32 : i32, i32
  }
}

</mosaic_0001>

<bundles_post_ra>
// kernel: tpu_custom_call.1
= control target key start
LH: loop header
LB: loop body
LE: loop exit
PB: predicated region body
PF: predicated region fallthrough
CT: control target
= control target key end

     0   :  { %18 = vsyncpa [#allocation3], 0  ;;  %s1137_s0 = inlined_call_operand.hbm [shape: f32[24,128], index: 0, kind: input, shape index: {}]   ;;  %s1138_s1 = inlined_call_operand.hbm [shape: bf16[128,128], index: 1, kind: input, shape index: {}]   ;;  %s1139_s2 = inlined_call_operand.vmem [shape: f32[1,128], index: 2, kind: input, shape index: {}]   ;;  %s1140_s3 = inlined_call_operand.vmem [shape: f32[1,128], index: 3, kind: input, shape index: {}]   ;;  %s1141_s4 = inlined_call_operand.vmem [shape: f32[1,128], index: 4, kind: input, shape index: {}]   ;;  %s1142_s5 = inlined_call_operand.hbm [shape: bf16[128,128], index: 5, kind: input, shape index: {}]   ;;  %s1143_s6 = inlined_call_operand.vmem [shape: f32[1,128], index: 6, kind: input, shape index: {}]   ;;  %s1144_s7 = inlined_call_operand.vmem [shape: f32[1,128], index: 7, kind: input, shape index: {}]   ;;  %s1145_s8 = inlined_call_operand.vmem [shape: f32[1,128], index: 8, kind: input, shape index: {}]   ;;  %s1146_s9 = inlined_call_operand.hbm [shape: bf16[128,128], index: 9, kind: input, shape index: {}]   ;;  %s1147_s10 = inlined_call_operand.vmem [shape: f32[1,128], index: 10, kind: input, shape index: {}]   ;;  %s1148_s11 = inlined_call_operand.vmem [shape: f32[1,128], index: 11, kind: input, shape index: {}]   ;;  %s1149_s12 = inlined_call_operand.vmem [shape: f32[1,128], index: 12, kind: input, shape index: {}]   ;;  %s1150_s13 = inlined_call_operand.hbm [shape: f32[24,128], index: 13, kind: output, shape index: {}]  }
   0x1   :  { %19 = vsyncpa [#allocation6], 0 }
   0x2   :  { %20 = vsyncpa [#allocation9], 0  ;;  %s39_s27 = sshll.u32 %s1138_s1, 4  ;;  %s40_s27 = int_to_ptr.hbm [resolvable:$true] %s39_s27 }
   0x3   :  { %21 = vsyncpa [#allocation4], 0  ;;  %s949_s28 = smov [#allocation5]   ;;  %s26_s15 = sshll.u32 %s1137_s0, 4  ;;  %s27_s15 = int_to_ptr.hbm [resolvable:$true] %s26_s15 }
   0x4   :  { %s41_s29 = sshll.u32 %s949_s28, 4  ;;  %s950_s16 = smov 64   ;;  %s42_s29 = int_to_ptr.vmem [resolvable:$true] %s41_s29 }
   0x5   :  { %s951_s17 = smov 4   ;;  %s952_s18 = smov [#allocation2]  }
   0x6   :  { %47 = dma.hbm_to_vmem [thread:$0]  %s40_s27, 1024, %s42_s29, [#allocation6], %s950_s16, %s950_s16, %s951_s17  }
   0x7   :  { %s28_s19 = sshll.u32 %s952_s18, 4  ;;  %s953_s20 = smov 128   ;;  %s29_s19 = int_to_ptr.vmem [resolvable:$true] %s28_s19 }
   0x8   :  { %s954_s21 = smov 8   ;;  %s58_s23 = sshll.u32 %s1142_s5, 4  ;;  %s59_s23 = int_to_ptr.hbm [resolvable:$true] %s58_s23 }
   0x9   :  { %34 = dma.hbm_to_vmem [thread:$0]  %s27_s15, 384, %s29_s19, [#allocation3], %s953_s20, %s953_s20, %s954_s21  }
   0xa   :  { %s955_s24 = smov [#allocation7]   ;;  %s77_s27 = sshll.u32 %s1146_s9, 4  ;;  %s78_s27 = int_to_ptr.hbm [resolvable:$true] %s77_s27 }
   0xb   :  { %s60_s0 = sshll.u32 %s955_s24, 4  ;;  %s956_s28 = smov [#allocation8]   ;;  %s61_s0 = int_to_ptr.vmem [resolvable:$true] %s60_s0 }
   0xc   :  { %66 = dma.hbm_to_vmem [thread:$0]  %s59_s23, 1024, %s61_s0, [#allocation6], %s950_s16, %s950_s16, %s951_s17  }
   0xd   :  { %s79_s29 = sshll.u32 %s956_s28, 4  ;;  %s80_s29 = int_to_ptr.vmem [resolvable:$true] %s79_s29 }
   0xe   :  { %85 = dma.hbm_to_vmem [thread:$0]  %s78_s27, 1024, %s80_s29, [#allocation9], %s950_s16, %s950_s16, %s951_s17  }
   0xf   :  { %941 = dma.done.wait [#allocation3], 384  }
  0x10   :  { %942 = vsyncadd [#allocation3], 4294966912 }
  0x11   :  { %943 = dma.done.wait [#allocation6], 2048  }
  0x12   :  { %944 = vsyncadd [#allocation6], 4294965248 }
  0x13   :  { %945 = dma.done.wait [#allocation9], 1024  }
  0x14   :  { %946 = vsyncadd [#allocation9], 4294966272  ;;  %v760_v0 = vld [vmem:[#allocation5 + $0x38] sm:$0xff]  ;;  %v759_v1 = vld [vmem:[#allocation5 + $0x30] sm:$0xff]  ;;  %s642_s0 = sshll.u32 %s1150_s13, 4  ;;  %s643_s0 = int_to_ptr.hbm [resolvable:$true] %s642_s0 }
  0x15   :  { %181 = vmatpush.bf16.msra.mxu0 %v760_v0  ;;  %777 = vmatpush.bf16.msra.mxu3 %v760_v0  ;;  %v758_v2 = vld [vmem:[#allocation5 + $0x28] sm:$0xff]  ;;  %v757_v3 = vld [vmem:[#allocation5 + $0x20] sm:$0xff]  ;;  %v756_v4 = vld [vmem:[#allocation5 + $0x18] sm:$0xff] }
  0x16   :  { %v755_v5 = vld [vmem:[#allocation5 + $0x10] sm:$0xff]  ;;  %v754_v6 = vld [vmem:[#allocation5 + $0x8] sm:$0xff]  ;;  %v753_v7 = vld [vmem:[#allocation5] sm:$0xff] }
  0x17   :  { %v1043_v8 = vld [vmem:[#allocation2] sm:$0xff]  ;;  %v1045_v9 = vld [vmem:[#allocation2 + $0x8] sm:$0xff]  ;;  %v1047_v10 = vld [vmem:[#allocation2 + $0x10] sm:$0xff] }
  0x18   :  { %v111_v11 = vpack.c.bf16 %v1045_v9, %v1043_v8  ;;  %v112_v12 = vpack.c.bf16 %v1047_v10, %v1047_v10  ;;  %v794_v13 = vld [vmem:[%s1139_s2] ss:$0 sm:$0xff]  ;;  %v768_v24 = vld [vmem:[#allocation7 + $0x38] sm:$0xff]  ;;  %v767_v25 = vld [vmem:[#allocation7 + $0x30] sm:$0xff] }
  0x19   :  { %182 = vmatpush.bf16.msra.mxu0 %v759_v1  ;;  %778 = vmatpush.bf16.msra.mxu3 %v759_v1  ;;  %v766_v26 = vld [vmem:[#allocation7 + $0x28] sm:$0xff]  ;;  %v765_v27 = vld [vmem:[#allocation7 + $0x20] sm:$0xff]  ;;  %v764_v28 = vld [vmem:[#allocation7 + $0x18] sm:$0xff] }
  0x1a   :  { %355 = vmatpush.bf16.msra.mxu1 %v768_v24  ;;  %v763_v34 = vld [vmem:[#allocation7 + $0x10] sm:$0xff]  ;;  %v762_v36 = vld [vmem:[#allocation7 + $0x8] sm:$0xff]  ;;  %v761_v42 = vld [vmem:[#allocation7] sm:$0xff] }
  0x1d   :  { %183 = vmatpush.bf16.msra.mxu0 %v758_v2  ;;  %779 = vmatpush.bf16.msra.mxu3 %v758_v2 }
  0x1e   :  { %356 = vmatpush.bf16.msra.mxu1 %v767_v25 }
  0x21   :  { %184 = vmatpush.bf16.msra.mxu0 %v757_v3  ;;  %780 = vmatpush.bf16.msra.mxu3 %v757_v3 }
  0x22   :  { %357 = vmatpush.bf16.msra.mxu1 %v766_v26 }
  0x25   :  { %185 = vmatpush.bf16.msra.mxu0 %v756_v4  ;;  %781 = vmatpush.bf16.msra.mxu3 %v756_v4 }
  0x26   :  { %358 = vmatpush.bf16.msra.mxu1 %v765_v27 }
  0x29   :  { %186 = vmatpush.bf16.msra.mxu0 %v755_v5  ;;  %782 = vmatpush.bf16.msra.mxu3 %v755_v5 }
  0x2a   :  { %359 = vmatpush.bf16.msra.mxu1 %v764_v28 }
  0x2d   :  { %187 = vmatpush.bf16.msra.mxu0 %v754_v6  ;;  %783 = vmatpush.bf16.msra.mxu3 %v754_v6 }
  0x2e   :  { %360 = vmatpush.bf16.msra.mxu1 %v763_v34 }
  0x31   :  { %188 = vmatpush.bf16.msra.mxu0 %v753_v7  ;;  %784 = vmatpush.bf16.msra.mxu3 %v753_v7 }
  0x32   :  { %361 = vmatpush.bf16.msra.mxu1 %v762_v36  ;;  %v797_v36 = vld [vmem:[%s1143_s6] ss:$0 sm:$0xff] }
  0x34   :  { %189 = vmatmul.bf16.vlgmr.msra.gmra.mxu0 %v111_v11  ;;  %194 = vmatmul.bf16.vlgmr.msra.gmra.mxu3 %v112_v12  ;;  %v795_v11 = vld [vmem:[%s1140_s3] ss:$0 sm:$0xff] }
  0x36   :  { %362 = vmatpush.bf16.msra.mxu1 %v761_v42 }
  0xb1   :  { %v190_v14 = vpop.f32.mrf.mxu0 }
  0xb2   :  { %v1056_v15 = vadd.f32 %v794_v13, %v190_v14 }
  0xb4   :  { %201 = vadd.xlane.f32.xlu0 %v1056_v15  ;;  %v207_v16 = vmul.f32 %v1056_v15, %v1056_v15 }
  0xb6   :  { %210 = vadd.xlane.f32.xlu1 %v207_v16 }
  0xb7   :  { %v195_v17 = vpop.f32.mrf.mxu3 }
  0xb8   :  { %v1061_v18 = vadd.f32 %v794_v13, %v195_v17 }
  0xb9   :  { %v192_v19 = vpop.f32.mrf.mxu0 }
  0xba   :  { %v1063_v20 = vadd.f32 %v794_v13, %v192_v19  ;;  %205 = vadd.xlane.f32.xlu2 %v1061_v18  ;;  %v209_v22 = vmul.f32 %v1061_v18, %v1061_v18 }
  0xbc   :  { %203 = vadd.xlane.f32.xlu0 %v1063_v20  ;;  %v208_v21 = vmul.f32 %v1063_v20, %v1063_v20 }
  0xbe   :  { %212 = vadd.xlane.f32.xlu1 %v208_v21 }
  0xbf   :  { %v197_v23 = vpop.f32.mrf.mxu3 }
  0xc2   :  { %214 = vadd.xlane.f32.xlu2 %v209_v22 }
 0x127   :  { %v202_v29 = vpop.xlane.xlu0 %201 }
 0x128   :  { %v216_v30 = vmul.f32 0.010416667, %v202_v29 }
 0x129   :  { %v211_v31 = vpop.xlane.xlu1 %210 }
 0x12a   :  { %v222_v32 = vmul.f32 %v216_v30, %v216_v30  ;;  %v219_v33 = vmul.f32 0.010416667, %v211_v31  ;;  %v231_v3 = vsub.f32 %v1056_v15, %v216_v30  ;;  %v796_v15 = vld [vmem:[%s1141_s4] ss:$0 sm:$0xff] }
 0x12c   :  { %v225_v35 = vsub.f32 %v219_v33, %v222_v32 }
 0x12d   :  { %v206_v37 = vpop.xlane.xlu2 %205 }
 0x12e   :  { %v228_v38 = vmax.f32 %v225_v35, 0.0  ;;  %v218_v44 = vmul.f32 0.010416667, %v206_v37 }
 0x12f   :  { %v204_v39 = vpop.xlane.xlu0 %203 }
 0x130   :  { %v234_v40 = vadd.f32 1e-05, %v228_v38  ;;  %v217_v41 = vmul.f32 0.010416667, %v204_v39  ;;  %v224_v47 = vmul.f32 %v218_v44, %v218_v44  ;;  %v233_v28 = vsub.f32 %v1061_v18, %v218_v44 }
 0x131   :  { %v213_v43 = vpop.xlane.xlu1 %212 }
 0x132   :  { %803 = vrsqrt.f32 %v234_v40  ;;  %v223_v45 = vmul.f32 %v217_v41, %v217_v41  ;;  %v220_v46 = vmul.f32 0.010416667, %v213_v43  ;;  %vm243_vm1 = vweird.f32 %v234_v40 }
 0x133   :  { %v232_v16 = vsub.f32 %v1063_v20, %v217_v41 }
 0x134   :  { %v226_v48 = vsub.f32 %v220_v46, %v223_v45  ;;  %v776_v46 = vld [vmem:[#allocation8 + $0x38] sm:$0xff] }
 0x135   :  { %v215_v49 = vpop.xlane.xlu2 %214  ;;  %529 = vmatpush.bf16.msra.mxu2 %v776_v46 }
 0x136   :  { %v221_v50 = vmul.f32 0.010416667, %v215_v49  ;;  %v229_v51 = vmax.f32 %v226_v48, 0.0  ;;  %v774_v48 = vld [vmem:[#allocation8 + $0x28] sm:$0xff]  ;;  %v773_v49 = vld [vmem:[#allocation8 + $0x20] sm:$0xff] }
 0x138   :  { %v804_v52 = vpop.eup %803  ;;  %v227_v53 = vsub.f32 %v221_v50, %v224_v47  ;;  %v235_v55 = vadd.f32 1e-05, %v229_v51  ;;  %v775_v47 = vld [vmem:[#allocation8 + $0x30] sm:$0xff]  ;;  %v772_v50 = vld [vmem:[#allocation8 + $0x18] sm:$0xff] }
 0x139   :  { %v238_v54 = vmul.f32 %v804_v52, %v234_v40  ;;  %vm244_vm0 = vweird.f32 %v804_v52  ;;  %530 = vmatpush.bf16.msra.mxu2 %v775_v47 }
 0x13a   :  { %v230_v56 = vmax.f32 %v227_v53, 0.0  ;;  %805 = vrsqrt.f32 %v235_v55  ;;  %vm245_vm2 = vmor %vm243_vm1, %vm244_vm0  ;;  %vm253_vm4 = vweird.f32 %v235_v55 }
 0x13b   :  { %v239_v57 = vmul.f32 %v804_v52, %v238_v54 }
 0x13c   :  { %v236_v58 = vadd.f32 1e-05, %v230_v56  ;;  %v771_v56 = vld [vmem:[#allocation8 + $0x10] sm:$0xff] }
 0x13d   :  { %v240_v59 = vmul.f32 0.5, %v239_v57  ;;  %531 = vmatpush.bf16.msra.mxu2 %v774_v48 }
 0x13e   :  { %807 = vrsqrt.f32 %v236_v58  ;;  %vm263_vm6 = vweird.f32 %v236_v58 }
 0x13f   :  { %v241_v60 = vsub.f32 1.5, %v240_v59  ;;  %v770_v59 = vld [vmem:[#allocation8 + $0x8] sm:$0xff] }
 0x140   :  { %v806_v61 = vpop.eup %805 }
 0x141   :  { %v242_v62 = vmul.f32 %v804_v52, %v241_v60  ;;  %v248_v63 = vmul.f32 %v806_v61, %v235_v55  ;;  %vm254_vm3 = vweird.f32 %v806_v61  ;;  %532 = vmatpush.bf16.msra.mxu2 %v773_v49 }
 0x142   :  { %vm255_vm5 = vmor %vm253_vm4, %vm254_vm3 }
 0x143   :  { %v249_v1 = vmul.f32 %v806_v61, %v248_v63  ;;  %v246_v2 = vsel %vm245_vm2, %v804_v52, %v242_v62  ;;  %v769_v63 = vld [vmem:[#allocation8] sm:$0xff] }
 0x144   :  { %v808_v0 = vpop.eup %807  ;;  %v267_v7 = vmul.f32 %v246_v2, %v231_v3 }
 0x145   :  { %v258_v4 = vmul.f32 %v808_v0, %v236_v58  ;;  %v250_v5 = vmul.f32 0.5, %v249_v1  ;;  %vm264_vm7 = vweird.f32 %v808_v0  ;;  %533 = vmatpush.bf16.msra.mxu2 %v772_v50 }
 0x146   :  { %v273_v19 = vmul.f32 %v795_v11, %v267_v7  ;;  %vm265_vm8 = vmor %vm263_vm6, %vm264_vm7 }
 0x147   :  { %v259_v6 = vmul.f32 %v808_v0, %v258_v4  ;;  %v251_v12 = vsub.f32 1.5, %v250_v5 }
 0x148   :  { %v279_v25 = vadd.f32 %v796_v15, %v273_v19 }
 0x149   :  { %v260_v13 = vmul.f32 0.5, %v259_v6  ;;  %v252_v14 = vmul.f32 %v806_v61, %v251_v12  ;;  %534 = vmatpush.bf16.msra.mxu2 %v771_v56 }
 0x14a   :  { %v282_v20 = vmax.f32 %v279_v25, 0.0 }
 0x14b   :  { %v261_v17 = vsub.f32 1.5, %v260_v13  ;;  %v256_v21 = vsel %vm255_vm5, %v806_v61, %v252_v14 }
 0x14c   :  { %v268_v22 = vmul.f32 %v256_v21, %v232_v16 }
 0x14d   :  { %v262_v23 = vmul.f32 %v808_v0, %v261_v17  ;;  %535 = vmatpush.bf16.msra.mxu2 %v770_v59 }
 0x14e   :  { %v274_v24 = vmul.f32 %v795_v11, %v268_v22 }
 0x14f   :  { %v266_v27 = vsel %vm265_vm8, %v808_v0, %v262_v23 }
 0x150   :  { %v280_v26 = vadd.f32 %v796_v15, %v274_v24  ;;  %v269_v31 = vmul.f32 %v266_v27, %v233_v28 }
 0x151   :  { %536 = vmatpush.bf16.msra.mxu2 %v769_v63 }
 0x152   :  { %v283_v29 = vmax.f32 %v280_v26, 0.0  ;;  %v275_v32 = vmul.f32 %v795_v11, %v269_v31  ;;  %v798_v31 = vld [vmem:[%s1144_s7] ss:$0 sm:$0xff] }
 0x154   :  { %v285_v30 = vpack.c.bf16 %v283_v29, %v282_v20  ;;  %v281_v33 = vadd.f32 %v796_v15, %v275_v32 }
 0x156   :  { %363 = vmatmul.bf16.vlgmr.msra.gmra.mxu1 %v285_v30  ;;  %v284_v34 = vmax.f32 %v281_v33, 0.0 }
 0x158   :  { %v286_v35 = vpack.c.bf16 %v284_v34, %v284_v34 }
 0x166   :  { %368 = vmatmul.bf16.gmra.mxu1 %v286_v35 }
 0x1d3   :  { %v364_v37 = vpop.f32.mrf.mxu1 }
 0x1d4   :  { %v1083_v38 = vadd.f32 %v797_v36, %v364_v37 }
 0x1d6   :  { %375 = vadd.xlane.f32.xlu0 %v1083_v38  ;;  %v381_v18 = vmul.f32 %v1083_v38, %v1083_v38 }
 0x1d8   :  { %384 = vadd.xlane.f32.xlu2 %v381_v18 }
 0x1db   :  { %v366_v39 = vpop.f32.mrf.mxu1 }
 0x1dc   :  { %v1088_v40 = vadd.f32 %v797_v36, %v366_v39 }
 0x1de   :  { %377 = vadd.xlane.f32.xlu1 %v1088_v40  ;;  %v382_v41 = vmul.f32 %v1088_v40, %v1088_v40 }
 0x1e0   :  { %386 = vadd.xlane.f32.xlu0 %v382_v41 }
 0x1e3   :  { %v369_v42 = vpop.f32.mrf.mxu1 }
 0x1e4   :  { %v1093_v43 = vadd.f32 %v797_v36, %v369_v42 }
 0x1e6   :  { %379 = vadd.xlane.f32.xlu1 %v1093_v43  ;;  %v383_v44 = vmul.f32 %v1093_v43, %v1093_v43 }
 0x1e8   :  { %388 = vadd.xlane.f32.xlu2 %v383_v44 }
 0x1eb   :  { %v371_v45 = vpop.f32.mrf.mxu1 }
 0x249   :  { %v376_v51 = vpop.xlane.xlu0 %375 }
 0x24a   :  { %v390_v52 = vmul.f32 0.010416667, %v376_v51 }
 0x24b   :  { %v385_v53 = vpop.xlane.xlu2 %384 }
 0x24c   :  { %v396_v54 = vmul.f32 %v390_v52, %v390_v52  ;;  %v393_v55 = vmul.f32 0.010416667, %v385_v53  ;;  %v405_v20 = vsub.f32 %v1083_v38, %v390_v52  ;;  %v799_v38 = vld [vmem:[%s1145_s8] ss:$0 sm:$0xff] }
 0x24e   :  { %v399_v57 = vsub.f32 %v393_v55, %v396_v54 }
 0x250   :  { %v402_v58 = vmax.f32 %v399_v57, 0.0 }
 0x251   :  { %v378_v60 = vpop.xlane.xlu1 %377 }
 0x252   :  { %v408_v61 = vadd.f32 1e-05, %v402_v58  ;;  %v391_v62 = vmul.f32 0.010416667, %v378_v60  ;;  %v800_v58 = vld [vmem:[%s1147_s10] ss:$0 sm:$0xff] }
 0x253   :  { %v387_v0 = vpop.xlane.xlu0 %386 }
 0x254   :  { %809 = vrsqrt.f32 %v408_v61  ;;  %v397_v1 = vmul.f32 %v391_v62, %v391_v62  ;;  %v394_v2 = vmul.f32 0.010416667, %v387_v0  ;;  %vm417_vm10 = vweird.f32 %v408_v61 }
 0x255   :  { %v406_v36 = vsub.f32 %v1088_v40, %v391_v62 }
 0x256   :  { %v400_v3 = vsub.f32 %v394_v2, %v397_v1 }
 0x258   :  { %v403_v4 = vmax.f32 %v400_v3, 0.0 }
 0x259   :  { %v380_v5 = vpop.xlane.xlu1 %379 }
 0x25a   :  { %v810_v6 = vpop.eup %809  ;;  %v392_v7 = vmul.f32 0.010416667, %v380_v5  ;;  %v409_v12 = vadd.f32 1e-05, %v403_v4 }
 0x25b   :  { %v412_v11 = vmul.f32 %v810_v6, %v408_v61  ;;  %v389_v13 = vpop.xlane.xlu2 %388  ;;  %vm418_vm9 = vweird.f32 %v810_v6 }
 0x25c   :  { %v398_v14 = vmul.f32 %v392_v7, %v392_v7  ;;  %v395_v16 = vmul.f32 0.010416667, %v389_v13  ;;  %811 = vrsqrt.f32 %v409_v12  ;;  %vm419_vm11 = vmor %vm417_vm10, %vm418_vm9  ;;  %vm427_vm13 = vweird.f32 %v409_v12 }
 0x25d   :  { %v413_v17 = vmul.f32 %v810_v6, %v412_v11  ;;  %v407_v40 = vsub.f32 %v1093_v43, %v392_v7 }
 0x25e   :  { %v401_v19 = vsub.f32 %v395_v16, %v398_v14 }
 0x25f   :  { %v414_v15 = vmul.f32 0.5, %v413_v17 }
 0x260   :  { %v404_v21 = vmax.f32 %v401_v19, 0.0 }
 0x261   :  { %v415_v22 = vsub.f32 1.5, %v414_v15 }
 0x262   :  { %v410_v23 = vadd.f32 1e-05, %v404_v21  ;;  %v812_v24 = vpop.eup %811 }
 0x263   :  { %v416_v25 = vmul.f32 %v810_v6, %v415_v22  ;;  %v422_v26 = vmul.f32 %v812_v24, %v409_v12  ;;  %vm428_vm12 = vweird.f32 %v812_v24 }
 0x264   :  { %813 = vrsqrt.f32 %v410_v23  ;;  %vm429_vm14 = vmor %vm427_vm13, %vm428_vm12  ;;  %vm437_vm0 = vweird.f32 %v410_v23 }
 0x265   :  { %v423_v27 = vmul.f32 %v812_v24, %v422_v26  ;;  %v420_v28 = vsel %vm419_vm11, %v810_v6, %v416_v25 }
 0x266   :  { %v441_v30 = vmul.f32 %v420_v28, %v405_v20 }
 0x267   :  { %v424_v29 = vmul.f32 0.5, %v423_v27 }
 0x268   :  { %v447_v18 = vmul.f32 %v798_v31, %v441_v30 }
 0x269   :  { %v425_v33 = vsub.f32 1.5, %v424_v29 }
 0x26a   :  { %v814_v32 = vpop.eup %813  ;;  %v453_v46 = vadd.f32 %v799_v38, %v447_v18 }
 0x26b   :  { %v432_v34 = vmul.f32 %v814_v32, %v410_v23  ;;  %v426_v35 = vmul.f32 %v812_v24, %v425_v33  ;;  %vm438_vm15 = vweird.f32 %v814_v32 }
 0x26c   :  { %vm439_vm1 = vmor %vm437_vm0, %vm438_vm15  ;;  %v456_v49 = vmax.f32 %v453_v46, 0.0  ;;  %v802_v46 = vld [vmem:[%s1149_s12] ss:$0 sm:$0xff] }
 0x26d   :  { %v433_v37 = vmul.f32 %v814_v32, %v432_v34  ;;  %v430_v39 = vsel %vm429_vm14, %v812_v24, %v426_v35 }
 0x26e   :  { %v442_v42 = vmul.f32 %v430_v39, %v406_v36 }
 0x26f   :  { %v434_v41 = vmul.f32 0.5, %v433_v37 }
 0x270   :  { %v448_v45 = vmul.f32 %v798_v31, %v442_v42 }
 0x271   :  { %v435_v44 = vsub.f32 1.5, %v434_v41  ;;  %v801_v41 = vld [vmem:[%s1148_s11] ss:$0 sm:$0xff]  ;;  %s957_s11 = smov [#allocation10]  }
 0x272   :  { %v454_v47 = vadd.f32 %v799_v38, %v448_v45  ;;  %s640_s12 = sshll.u32 %s957_s11, 4  ;;  %s641_s12 = int_to_ptr.vmem [resolvable:$true] %s640_s12 }
 0x273   :  { %v436_v48 = vmul.f32 %v814_v32, %v435_v44 }
 0x274   :  { %v457_v50 = vmax.f32 %v454_v47, 0.0 }
 0x275   :  { %v440_v51 = vsel %vm439_vm1, %v814_v32, %v436_v48 }
 0x276   :  { %v459_v52 = vpack.c.bf16 %v457_v50, %v456_v49  ;;  %v443_v53 = vmul.f32 %v440_v51, %v407_v40 }
 0x278   :  { %537 = vmatmul.bf16.vlgmr.msra.gmra.mxu2 %v459_v52  ;;  %v449_v54 = vmul.f32 %v798_v31, %v443_v53 }
 0x27a   :  { %v455_v55 = vadd.f32 %v799_v38, %v449_v54 }
 0x27c   :  { %v458_v56 = vmax.f32 %v455_v55, 0.0 }
 0x27e   :  { %v460_v57 = vpack.c.bf16 %v458_v56, %v458_v56 }
 0x288   :  { %542 = vmatmul.bf16.gmra.mxu2 %v460_v57 }
 0x2fb   :  { %v538_v59 = vpop.f32.mrf.mxu2 }
 0x2fc   :  { %v539_v60 = vadd.f32 %v800_v58, %v538_v59 }
 0x2fe   :  { %v547_v61 = vadd.f32 %v539_v60, %v1043_v8 }
 0x300   :  { %552 = vadd.xlane.f32.xlu0 %v547_v61  ;;  %v558_v0 = vmul.f32 %v547_v61, %v547_v61 }
 0x303   :  { %v540_v43 = vpop.f32.mrf.mxu2 }
 0x304   :  { %v541_v62 = vadd.f32 %v800_v58, %v540_v43 }
 0x306   :  { %v1112_v63 = vadd.f32 %v541_v62, %v1045_v9 }
 0x308   :  { %554 = vadd.xlane.f32.xlu1 %v1112_v63  ;;  %561 = vadd.xlane.f32.xlu0 %v558_v0  ;;  %v559_v4 = vmul.f32 %v1112_v63, %v1112_v63 }
 0x30b   :  { %v543_v1 = vpop.f32.mrf.mxu2 }
 0x30c   :  { %v544_v2 = vadd.f32 %v800_v58, %v543_v1 }
 0x30e   :  { %v1116_v3 = vadd.f32 %v544_v2, %v1047_v10 }
 0x310   :  { %563 = vadd.xlane.f32.xlu1 %v559_v4  ;;  %556 = vadd.xlane.f32.xlu2 %v1116_v3  ;;  %v560_v9 = vmul.f32 %v1116_v3, %v1116_v3 }
 0x313   :  { %v545_v8 = vpop.f32.mrf.mxu2 }
 0x318   :  { %565 = vadd.xlane.f32.xlu2 %v560_v9 }
 0x373   :  { %v553_v5 = vpop.xlane.xlu0 %552 }
 0x374   :  { %v567_v6 = vmul.f32 0.01, %v553_v5 }
 0x376   :  { %v573_v12 = vmul.f32 %v567_v6, %v567_v6  ;;  %v582_v39 = vsub.f32 %v547_v61, %v567_v6 }
 0x37b   :  { %v555_v7 = vpop.xlane.xlu1 %554  ;;  %v562_v11 = vpop.xlane.xlu0 %561 }
 0x37c   :  { %v570_v13 = vmul.f32 0.01, %v562_v11  ;;  %v568_v10 = vmul.f32 0.01, %v555_v7 }
 0x37e   :  { %v576_v14 = vsub.f32 %v570_v13, %v573_v12  ;;  %v574_v21 = vmul.f32 %v568_v10, %v568_v10  ;;  %v583_v53 = vsub.f32 %v1112_v63, %v568_v10 }
 0x380   :  { %v579_v16 = vmax.f32 %v576_v14, 0.0 }
 0x382   :  { %v585_v17 = vadd.f32 1e-05, %v579_v16 }
 0x383   :  { %v564_v19 = vpop.xlane.xlu1 %563  ;;  %v557_v15 = vpop.xlane.xlu2 %556 }
 0x384   :  { %815 = vrsqrt.f32 %v585_v17  ;;  %v571_v22 = vmul.f32 0.01, %v564_v19  ;;  %v569_v25 = vmul.f32 0.01, %v557_v15  ;;  %vm594_vm3 = vweird.f32 %v585_v17 }
 0x386   :  { %v577_v23 = vsub.f32 %v571_v22, %v574_v21  ;;  %v575_v29 = vmul.f32 %v569_v25, %v569_v25  ;;  %v584_v43 = vsub.f32 %v1116_v3, %v569_v25 }
 0x388   :  { %v580_v24 = vmax.f32 %v577_v23, 0.0 }
 0x38a   :  { %v816_v26 = vpop.eup %815  ;;  %v586_v27 = vadd.f32 1e-05, %v580_v24 }
 0x38b   :  { %v589_v28 = vmul.f32 %v816_v26, %v585_v17  ;;  %v566_v20 = vpop.xlane.xlu2 %565  ;;  %vm595_vm2 = vweird.f32 %v816_v26 }
 0x38c   :  { %817 = vrsqrt.f32 %v586_v27  ;;  %v572_v30 = vmul.f32 0.01, %v566_v20  ;;  %vm596_vm4 = vmor %vm594_vm3, %vm595_vm2  ;;  %vm604_vm6 = vweird.f32 %v586_v27 }
 0x38d   :  { %v590_v31 = vmul.f32 %v816_v26, %v589_v28 }
 0x38e   :  { %v578_v32 = vsub.f32 %v572_v30, %v575_v29 }
 0x38f   :  { %v591_v33 = vmul.f32 0.5, %v590_v31 }
 0x390   :  { %v581_v34 = vmax.f32 %v578_v32, 0.0 }
 0x391   :  { %v592_v35 = vsub.f32 1.5, %v591_v33 }
 0x392   :  { %v818_v36 = vpop.eup %817  ;;  %v587_v37 = vadd.f32 1e-05, %v581_v34 }
 0x393   :  { %v593_v18 = vmul.f32 %v816_v26, %v592_v35  ;;  %v599_v38 = vmul.f32 %v818_v36, %v586_v27  ;;  %vm605_vm5 = vweird.f32 %v818_v36 }
 0x394   :  { %819 = vrsqrt.f32 %v587_v37  ;;  %vm606_vm7 = vmor %vm604_vm6, %vm605_vm5  ;;  %vm614_vm9 = vweird.f32 %v587_v37 }
 0x395   :  { %v597_v42 = vsel %vm596_vm4, %v816_v26, %v593_v18  ;;  %v600_v44 = vmul.f32 %v818_v36, %v599_v38 }
 0x396   :  { %v618_v45 = vmul.f32 %v597_v42, %v582_v39 }
 0x397   :  { %v601_v47 = vmul.f32 0.5, %v600_v44 }
 0x398   :  { %v624_v48 = vmul.f32 %v801_v41, %v618_v45 }
 0x399   :  { %v602_v40 = vsub.f32 1.5, %v601_v47 }
 0x39a   :  { %v820_v49 = vpop.eup %819  ;;  %v630_v50 = vadd.f32 %v802_v46, %v624_v48 }
 0x39b   :  { %v603_v51 = vmul.f32 %v818_v36, %v602_v40  ;;  %v609_v52 = vmul.f32 %v820_v49, %v587_v37  ;;  %vm615_vm8 = vweird.f32 %v820_v49 }
 0x39c   :  { %633 = vst [vmem:[#allocation10] sm:$0xff] %v630_v50  ;;  %vm616_vm10 = vmor %vm614_vm9, %vm615_vm8 }
 0x39d   :  { %v607_v54 = vsel %vm606_vm7, %v818_v36, %v603_v51  ;;  %v610_v55 = vmul.f32 %v820_v49, %v609_v52 }
 0x39e   :  { %v619_v56 = vmul.f32 %v607_v54, %v583_v53 }
 0x39f   :  { %v611_v57 = vmul.f32 0.5, %v610_v55 }
 0x3a0   :  { %v625_v58 = vmul.f32 %v801_v41, %v619_v56 }
 0x3a1   :  { %v612_v59 = vsub.f32 1.5, %v611_v57 }
 0x3a2   :  { %v631_v60 = vadd.f32 %v802_v46, %v625_v58 }
 0x3a3   :  { %v613_v61 = vmul.f32 %v820_v49, %v612_v59 }
 0x3a4   :  { %634 = vst [vmem:[#allocation10 + $0x8] sm:$0xff] %v631_v60 }
 0x3a5   :  { %v617_v62 = vsel %vm616_vm10, %v820_v49, %v613_v61 }
 0x3a6   :  { %v620_v0 = vmul.f32 %v617_v62, %v584_v43 }
 0x3a8   :  { %v626_v63 = vmul.f32 %v801_v41, %v620_v0 }
 0x3aa   :  { %v632_v1 = vadd.f32 %v802_v46, %v626_v63 }
 0x3ac   :  { %635 = vst [vmem:[#allocation10 + $0x10] sm:$0xff] %v632_v1 }
 0x3ad   :  { %648 = dma.vmem_to_hbm [thread:$0]  %s641_s12, 384, %s643_s0, [#allocation4], %s953_s20, %s953_s20, %s954_s21  }
 0x3ae   :  { %947 = dma.done.wait [#allocation4], 384  }
 0x3af   :  { %948 = vsyncadd [#allocation4], 4294966912 }
 0x3b0   :  { %653 = vsyncpa [#allocation3], 1 }
 0x3b1   :  { %654 = vsyncpa [#allocation6], 1 }
 0x3b2   :  { %655 = vsyncpa [#allocation9], 1 }
 0x3b3   :  { %656 = vsyncpa [#allocation4], 1 }

// kernel: tpu_custom_call.1
= control target key start
LH: loop header
LB: loop body
LE: loop exit
PB: predicated region body
PF: predicated region fallthrough
CT: control target
= control target key end

     0   :  { %18 = vsyncpa [#allocation3], 0  ;;  %s1137_s0 = inlined_call_operand.hbm [shape: f32[24,128], index: 0, kind: input, shape index: {}]   ;;  %s1138_s1 = inlined_call_operand.hbm [shape: bf16[128,128], index: 1, kind: input, shape index: {}]   ;;  %s1139_s2 = inlined_call_operand.vmem [shape: f32[1,128], index: 2, kind: input, shape index: {}]   ;;  %s1140_s3 = inlined_call_operand.vmem [shape: f32[1,128], index: 3, kind: input, shape index: {}]   ;;  %s1141_s4 = inlined_call_operand.vmem [shape: f32[1,128], index: 4, kind: input, shape index: {}]   ;;  %s1142_s5 = inlined_call_operand.hbm [shape: bf16[128,128], index: 5, kind: input, shape index: {}]   ;;  %s1143_s6 = inlined_call_operand.vmem [shape: f32[1,128], index: 6, kind: input, shape index: {}]   ;;  %s1144_s7 = inlined_call_operand.vmem [shape: f32[1,128], index: 7, kind: input, shape index: {}]   ;;  %s1145_s8 = inlined_call_operand.vmem [shape: f32[1,128], index: 8, kind: input, shape index: {}]   ;;  %s1146_s9 = inlined_call_operand.hbm [shape: bf16[128,128], index: 9, kind: input, shape index: {}]   ;;  %s1147_s10 = inlined_call_operand.vmem [shape: f32[1,128], index: 10, kind: input, shape index: {}]   ;;  %s1148_s11 = inlined_call_operand.vmem [shape: f32[1,128], index: 11, kind: input, shape index: {}]   ;;  %s1149_s12 = inlined_call_operand.vmem [shape: f32[1,128], index: 12, kind: input, shape index: {}]   ;;  %s1150_s13 = inlined_call_operand.hbm [shape: f32[24,128], index: 13, kind: output, shape index: {}]  }
   0x1   :  { %19 = vsyncpa [#allocation6], 0 }
   0x2   :  { %20 = vsyncpa [#allocation9], 0  ;;  %s39_s27 = sshll.u32 %s1138_s1, 4  ;;  %s40_s27 = int_to_ptr.hbm [resolvable:$true] %s39_s27 }
   0x3   :  { %21 = vsyncpa [#allocation4], 0  ;;  %s949_s28 = smov [#allocation5]   ;;  %s26_s15 = sshll.u32 %s1137_s0, 4  ;;  %s27_s15 = int_to_ptr.hbm [resolvable:$true] %s26_s15 }
   0x4   :  { %s41_s29 = sshll.u32 %s949_s28, 4  ;;  %s950_s16 = smov 64   ;;  %s42_s29 = int_to_ptr.vmem [resolvable:$true] %s41_s29 }
   0x5   :  { %s951_s17 = smov 4   ;;  %s952_s18 = smov [#allocation2]  }
   0x6   :  { %47 = dma.hbm_to_vmem [thread:$0]  %s40_s27, 1024, %s42_s29, [#allocation6], %s950_s16, %s950_s16, %s951_s17  }
   0x7   :  { %s28_s19 = sshll.u32 %s952_s18, 4  ;;  %s953_s20 = smov 128   ;;  %s29_s19 = int_to_ptr.vmem [resolvable:$true] %s28_s19 }
   0x8   :  { %s954_s21 = smov 8   ;;  %s58_s23 = sshll.u32 %s1142_s5, 4  ;;  %s59_s23 = int_to_ptr.hbm [resolvable:$true] %s58_s23 }
   0x9   :  { %34 = dma.hbm_to_vmem [thread:$0]  %s27_s15, 384, %s29_s19, [#allocation3], %s953_s20, %s953_s20, %s954_s21  }
   0xa   :  { %s955_s24 = smov [#allocation7]   ;;  %s77_s27 = sshll.u32 %s1146_s9, 4  ;;  %s78_s27 = int_to_ptr.hbm [resolvable:$true] %s77_s27 }
   0xb   :  { %s60_s0 = sshll.u32 %s955_s24, 4  ;;  %s956_s28 = smov [#allocation8]   ;;  %s61_s0 = int_to_ptr.vmem [resolvable:$true] %s60_s0 }
   0xc   :  { %66 = dma.hbm_to_vmem [thread:$0]  %s59_s23, 1024, %s61_s0, [#allocation6], %s950_s16, %s950_s16, %s951_s17  }
   0xd   :  { %s79_s29 = sshll.u32 %s956_s28, 4  ;;  %s80_s29 = int_to_ptr.vmem [resolvable:$true] %s79_s29 }
   0xe   :  { %85 = dma.hbm_to_vmem [thread:$0]  %s78_s27, 1024, %s80_s29, [#allocation9], %s950_s16, %s950_s16, %s951_s17  }
   0xf   :  { %941 = dma.done.wait [#allocation3], 384  }
  0x10   :  { %942 = vsyncadd [#allocation3], 4294966912 }
  0x11   :  { %943 = dma.done.wait [#allocation6], 2048  }
  0x12   :  { %944 = vsyncadd [#allocation6], 4294965248 }
  0x13   :  { %945 = dma.done.wait [#allocation9], 1024  }
  0x14   :  { %946 = vsyncadd [#allocation9], 4294966272  ;;  %v760_v0 = vld [vmem:[#allocation5 + $0x38] sm:$0xff]  ;;  %v759_v1 = vld [vmem:[#allocation5 + $0x30] sm:$0xff]  ;;  %s642_s0 = sshll.u32 %s1150_s13, 4  ;;  %s643_s0 = int_to_ptr.hbm [resolvable:$true] %s642_s0 }
  0x15   :  { %181 = vmatpush.bf16.msra.mxu0 %v760_v0  ;;  %777 = vmatpush.bf16.msra.mxu3 %v760_v0  ;;  %v758_v2 = vld [vmem:[#allocation5 + $0x28] sm:$0xff]  ;;  %v757_v3 = vld [vmem:[#allocation5 + $0x20] sm:$0xff]  ;;  %v756_v4 = vld [vmem:[#allocation5 + $0x18] sm:$0xff] }
  0x16   :  { %v755_v5 = vld [vmem:[#allocation5 + $0x10] sm:$0xff]  ;;  %v754_v6 = vld [vmem:[#allocation5 + $0x8] sm:$0xff]  ;;  %v753_v7 = vld [vmem:[#allocation5] sm:$0xff] }
  0x17   :  { %v1043_v8 = vld [vmem:[#allocation2] sm:$0xff]  ;;  %v1045_v9 = vld [vmem:[#allocation2 + $0x8] sm:$0xff]  ;;  %v1047_v10 = vld [vmem:[#allocation2 + $0x10] sm:$0xff] }
  0x18   :  { %v111_v11 = vpack.c.bf16 %v1045_v9, %v1043_v8  ;;  %v112_v12 = vpack.c.bf16 %v1047_v10, %v1047_v10  ;;  %v794_v13 = vld [vmem:[%s1139_s2] ss:$0 sm:$0xff]  ;;  %v768_v24 = vld [vmem:[#allocation7 + $0x38] sm:$0xff]  ;;  %v767_v25 = vld [vmem:[#allocation7 + $0x30] sm:$0xff] }
  0x19   :  { %182 = vmatpush.bf16.msra.mxu0 %v759_v1  ;;  %778 = vmatpush.bf16.msra.mxu3 %v759_v1  ;;  %v766_v26 = vld [vmem:[#allocation7 + $0x28] sm:$0xff]  ;;  %v765_v27 = vld [vmem:[#allocation7 + $0x20] sm:$0xff]  ;;  %v764_v28 = vld [vmem:[#allocation7 + $0x18] sm:$0xff] }
  0x1a   :  { %355 = vmatpush.bf16.msra.mxu1 %v768_v24  ;;  %v763_v34 = vld [vmem:[#allocation7 + $0x10] sm:$0xff]  ;;  %v762_v36 = vld [vmem:[#allocation7 + $0x8] sm:$0xff]  ;;  %v761_v42 = vld [vmem:[#allocation7] sm:$0xff] }
  0x1d   :  { %183 = vmatpush.bf16.msra.mxu0 %v758_v2  ;;  %779 = vmatpush.bf16.msra.mxu3 %v758_v2 }
  0x1e   :  { %356 = vmatpush.bf16.msra.mxu1 %v767_v25 }
  0x21   :  { %184 = vmatpush.bf16.msra.mxu0 %v757_v3  ;;  %780 = vmatpush.bf16.msra.mxu3 %v757_v3 }
  0x22   :  { %357 = vmatpush.bf16.msra.mxu1 %v766_v26 }
  0x25   :  { %185 = vmatpush.bf16.msra.mxu0 %v756_v4  ;;  %781 = vmatpush.bf16.msra.mxu3 %v756_v4 }
  0x26   :  { %358 = vmatpush.bf16.msra.mxu1 %v765_v27 }
  0x29   :  { %186 = vmatpush.bf16.msra.mxu0 %v755_v5  ;;  %782 = vmatpush.bf16.msra.mxu3 %v755_v5 }
  0x2a   :  { %359 = vmatpush.bf16.msra.mxu1 %v764_v28 }
  0x2d   :  { %187 = vmatpush.bf16.msra.mxu0 %v754_v6  ;;  %783 = vmatpush.bf16.msra.mxu3 %v754_v6 }
  0x2e   :  { %360 = vmatpush.bf16.msra.mxu1 %v763_v34 }
  0x31   :  { %188 = vmatpush.bf16.msra.mxu0 %v753_v7  ;;  %784 = vmatpush.bf16.msra.mxu3 %v753_v7 }
  0x32   :  { %361 = vmatpush.bf16.msra.mxu1 %v762_v36  ;;  %v797_v36 = vld [vmem:[%s1143_s6] ss:$0 sm:$0xff] }
  0x34   :  { %189 = vmatmul.bf16.vlgmr.msra.gmra.mxu0 %v111_v11  ;;  %194 = vmatmul.bf16.vlgmr.msra.gmra.mxu3 %v112_v12  ;;  %v795_v11 = vld [vmem:[%s1140_s3] ss:$0 sm:$0xff] }
  0x36   :  { %362 = vmatpush.bf16.msra.mxu1 %v761_v42 }
  0xb1   :  { %v190_v14 = vpop.f32.mrf.mxu0 }
  0xb2   :  { %v1056_v15 = vadd.f32 %v794_v13, %v190_v14 }
  0xb4   :  { %201 = vadd.xlane.f32.xlu0 %v1056_v15  ;;  %v207_v16 = vmul.f32 %v1056_v15, %v1056_v15 }
  0xb6   :  { %210 = vadd.xlane.f32.xlu1 %v207_v16 }
  0xb7   :  { %v195_v17 = vpop.f32.mrf.mxu3 }
  0xb8   :  { %v1061_v18 = vadd.f32 %v794_v13, %v195_v17 }
  0xb9   :  { %v192_v19 = vpop.f32.mrf.mxu0 }
  0xba   :  { %v1063_v20 = vadd.f32 %v794_v13, %v192_v19  ;;  %205 = vadd.xlane.f32.xlu2 %v1061_v18  ;;  %v209_v22 = vmul.f32 %v1061_v18, %v1061_v18 }
  0xbc   :  { %203 = vadd.xlane.f32.xlu0 %v1063_v20  ;;  %v208_v21 = vmul.f32 %v1063_v20, %v1063_v20 }
  0xbe   :  { %212 = vadd.xlane.f32.xlu1 %v208_v21 }
  0xbf   :  { %v197_v23 = vpop.f32.mrf.mxu3 }
  0xc2   :  { %214 = vadd.xlane.f32.xlu2 %v209_v22 }
 0x127   :  { %v202_v29 = vpop.xlane.xlu0 %201 }
 0x128   :  { %v216_v30 = vmul.f32 0.010416667, %v202_v29 }
 0x129   :  { %v211_v31 = vpop.xlane.xlu1 %210 }
 0x12a   :  { %v222_v32 = vmul.f32 %v216_v30, %v216_v30  ;;  %v219_v33 = vmul.f32 0.010416667, %v211_v31  ;;  %v231_v3 = vsub.f32 %v1056_v15, %v216_v30  ;;  %v796_v15 = vld [vmem:[%s1141_s4] ss:$0 sm:$0xff] }
 0x12c   :  { %v225_v35 = vsub.f32 %v219_v33, %v222_v32 }
 0x12d   :  { %v206_v37 = vpop.xlane.xlu2 %205 }
 0x12e   :  { %v228_v38 = vmax.f32 %v225_v35, 0.0  ;;  %v218_v44 = vmul.f32 0.010416667, %v206_v37 }
 0x12f   :  { %v204_v39 = vpop.xlane.xlu0 %203 }
 0x130   :  { %v234_v40 = vadd.f32 1e-05, %v228_v38  ;;  %v217_v41 = vmul.f32 0.010416667, %v204_v39  ;;  %v224_v47 = vmul.f32 %v218_v44, %v218_v44  ;;  %v233_v28 = vsub.f32 %v1061_v18, %v218_v44 }
 0x131   :  { %v213_v43 = vpop.xlane.xlu1 %212 }
 0x132   :  { %803 = vrsqrt.f32 %v234_v40  ;;  %v223_v45 = vmul.f32 %v217_v41, %v217_v41  ;;  %v220_v46 = vmul.f32 0.010416667, %v213_v43  ;;  %vm243_vm1 = vweird.f32 %v234_v40 }
 0x133   :  { %v232_v16 = vsub.f32 %v1063_v20, %v217_v41 }
 0x134   :  { %v226_v48 = vsub.f32 %v220_v46, %v223_v45  ;;  %v776_v46 = vld [vmem:[#allocation8 + $0x38] sm:$0xff] }
 0x135   :  { %v215_v49 = vpop.xlane.xlu2 %214  ;;  %529 = vmatpush.bf16.msra.mxu2 %v776_v46 }
 0x136   :  { %v221_v50 = vmul.f32 0.010416667, %v215_v49  ;;  %v229_v51 = vmax.f32 %v226_v48, 0.0  ;;  %v774_v48 = vld [vmem:[#allocation8 + $0x28] sm:$0xff]  ;;  %v773_v49 = vld [vmem:[#allocation8 + $0x20] sm:$0xff] }
 0x138   :  { %v804_v52 = vpop.eup %803  ;;  %v227_v53 = vsub.f32 %v221_v50, %v224_v47  ;;  %v235_v55 = vadd.f32 1e-05, %v229_v51  ;;  %v775_v47 = vld [vmem:[#allocation8 + $0x30] sm:$0xff]  ;;  %v772_v50 = vld [vmem:[#allocation8 + $0x18] sm:$0xff] }
 0x139   :  { %v238_v54 = vmul.f32 %v804_v52, %v234_v40  ;;  %vm244_vm0 = vweird.f32 %v804_v52  ;;  %530 = vmatpush.bf16.msra.mxu2 %v775_v47 }
 0x13a   :  { %v230_v56 = vmax.f32 %v227_v53, 0.0  ;;  %805 = vrsqrt.f32 %v235_v55  ;;  %vm245_vm2 = vmor %vm243_vm1, %vm244_vm0  ;;  %vm253_vm4 = vweird.f32 %v235_v55 }
 0x13b   :  { %v239_v57 = vmul.f32 %v804_v52, %v238_v54 }
 0x13c   :  { %v236_v58 = vadd.f32 1e-05, %v230_v56  ;;  %v771_v56 = vld [vmem:[#allocation8 + $0x10] sm:$0xff] }
 0x13d   :  { %v240_v59 = vmul.f32 0.5, %v239_v57  ;;  %531 = vmatpush.bf16.msra.mxu2 %v774_v48 }
 0x13e   :  { %807 = vrsqrt.f32 %v236_v58  ;;  %vm263_vm6 = vweird.f32 %v236_v58 }
 0x13f   :  { %v241_v60 = vsub.f32 1.5, %v240_v59  ;;  %v770_v59 = vld [vmem:[#allocation8 + $0x8] sm:$0xff] }
 0x140   :  { %v806_v61 = vpop.eup %805 }
 0x141   :  { %v242_v62 = vmul.f32 %v804_v52, %v241_v60  ;;  %v248_v63 = vmul.f32 %v806_v61, %v235_v55  ;;  %vm254_vm3 = vweird.f32 %v806_v61  ;;  %532 = vmatpush.bf16.msra.mxu2 %v773_v49 }
 0x142   :  { %vm255_vm5 = vmor %vm253_vm4, %vm254_vm3 }
 0x143   :  { %v249_v1 = vmul.f32 %v806_v61, %v248_v63  ;;  %v246_v2 = vsel %vm245_vm2, %v804_v52, %v242_v62  ;;  %v769_v63 = vld [vmem:[#allocation8] sm:$0xff] }
 0x144   :  { %v808_v0 = vpop.eup %807  ;;  %v267_v7 = vmul.f32 %v246_v2, %v231_v3 }
 0x145   :  { %v258_v4 = vmul.f32 %v808_v0, %v236_v58  ;;  %v250_v5 = vmul.f32 0.5, %v249_v1  ;;  %vm264_vm7 = vweird.f32 %v808_v0  ;;  %533 = vmatpush.bf16.msra.mxu2 %v772_v50 }
 0x146   :  { %v273_v19 = vmul.f32 %v795_v11, %v267_v7  ;;  %vm265_vm8 = vmor %vm263_vm6, %vm264_vm7 }
 0x147   :  { %v259_v6 = vmul.f32 %v808_v0, %v258_v4  ;;  %v251_v12 = vsub.f32 1.5, %v250_v5 }
 0x148   :  { %v279_v25 = vadd.f32 %v796_v15, %v273_v19 }
 0x149   :  { %v260_v13 = vmul.f32 0.5, %v259_v6  ;;  %v252_v14 = vmul.f32 %v806_v61, %v251_v12  ;;  %534 = vmatpush.bf16.msra.mxu2 %v771_v56 }
 0x14a   :  { %v282_v20 = vmax.f32 %v279_v25, 0.0 }
 0x14b   :  { %v261_v17 = vsub.f32 1.5, %v260_v13  ;;  %v256_v21 = vsel %vm255_vm5, %v806_v61, %v252_v14 }
 0x14c   :  { %v268_v22 = vmul.f32 %v256_v21, %v232_v16 }
 0x14d   :  { %v262_v23 = vmul.f32 %v808_v0, %v261_v17  ;;  %535 = vmatpush.bf16.msra.mxu2 %v770_v59 }
 0x14e   :  { %v274_v24 = vmul.f32 %v795_v11, %v268_v22 }
 0x14f   :  { %v266_v27 = vsel %vm265_vm8, %v808_v0, %v262_v23 }
 0x150   :  { %v280_v26 = vadd.f32 %v796_v15, %v274_v24  ;;  %v269_v31 = vmul.f32 %v266_v27, %v233_v28 }
 0x151   :  { %536 = vmatpush.bf16.msra.mxu2 %v769_v63 }
 0x152   :  { %v283_v29 = vmax.f32 %v280_v26, 0.0  ;;  %v275_v32 = vmul.f32 %v795_v11, %v269_v31  ;;  %v798_v31 = vld [vmem:[%s1144_s7] ss:$0 sm:$0xff] }
 0x154   :  { %v285_v30 = vpack.c.bf16 %v283_v29, %v282_v20  ;;  %v281_v33 = vadd.f32 %v796_v15, %v275_v32 }
 0x156   :  { %363 = vmatmul.bf16.vlgmr.msra.gmra.mxu1 %v285_v30  ;;  %v284_v34 = vmax.f32 %v281_v33, 0.0 }
 0x158   :  { %v286_v35 = vpack.c.bf16 %v284_v34, %v284_v34 }
 0x166   :  { %368 = vmatmul.bf16.gmra.mxu1 %v286_v35 }
 0x1d3   :  { %v364_v37 = vpop.f32.mrf.mxu1 }
 0x1d4   :  { %v1083_v38 = vadd.f32 %v797_v36, %v364_v37 }
 0x1d6   :  { %375 = vadd.xlane.f32.xlu0 %v1083_v38  ;;  %v381_v18 = vmul.f32 %v1083_v38, %v1083_v38 }
 0x1d8   :  { %384 = vadd.xlane.f32.xlu2 %v381_v18 }
 0x1db   :  { %v366_v39 = vpop.f32.mrf.mxu1 }
 0x1dc   :  { %v1088_v40 = vadd.f32 %v797_v36, %v366_v39 }
 0x1de   :  { %377 = vadd.xlane.f32.xlu1 %v1088_v40  ;;  %v382_v41 = vmul.f32 %v1088_v40, %v1088_v40 }
 0x1e0   :  { %386 = vadd.xlane.f32.xlu0 %v382_v41 }
 0x1e3   :  { %v369_v42 = vpop.f32.mrf.mxu1 }
 0x1e4   :  { %v1093_v43 = vadd.f32 %v797_v36, %v369_v42 }
 0x1e6   :  { %379 = vadd.xlane.f32.xlu1 %v1093_v43  ;;  %v383_v44 = vmul.f32 %v1093_v43, %v1093_v43 }
 0x1e8   :  { %388 = vadd.xlane.f32.xlu2 %v383_v44 }
 0x1eb   :  { %v371_v45 = vpop.f32.mrf.mxu1 }
 0x249   :  { %v376_v51 = vpop.xlane.xlu0 %375 }
 0x24a   :  { %v390_v52 = vmul.f32 0.010416667, %v376_v51 }
 0x24b   :  { %v385_v53 = vpop.xlane.xlu2 %384 }
 0x24c   :  { %v396_v54 = vmul.f32 %v390_v52, %v390_v52  ;;  %v393_v55 = vmul.f32 0.010416667, %v385_v53  ;;  %v405_v20 = vsub.f32 %v1083_v38, %v390_v52  ;;  %v799_v38 = vld [vmem:[%s1145_s8] ss:$0 sm:$0xff] }
 0x24e   :  { %v399_v57 = vsub.f32 %v393_v55, %v396_v54 }
 0x250   :  { %v402_v58 = vmax.f32 %v399_v57, 0.0 }
 0x251   :  { %v378_v60 = vpop.xlane.xlu1 %377 }
 0x252   :  { %v408_v61 = vadd.f32 1e-05, %v402_v58  ;;  %v391_v62 = vmul.f32 0.010416667, %v378_v60  ;;  %v800_v58 = vld [vmem:[%s1147_s10] ss:$0 sm:$0xff] }
 0x253   :  { %v387_v0 = vpop.xlane.xlu0 %386 }
 0x254   :  { %809 = vrsqrt.f32 %v408_v61  ;;  %v397_v1 = vmul.f32 %v391_v62, %v391_v62  ;;  %v394_v2 = vmul.f32 0.010416667, %v387_v0  ;;  %vm417_vm10 = vweird.f32 %v408_v61 }
 0x255   :  { %v406_v36 = vsub.f32 %v1088_v40, %v391_v62 }
 0x256   :  { %v400_v3 = vsub.f32 %v394_v2, %v397_v1 }
 0x258   :  { %v403_v4 = vmax.f32 %v400_v3, 0.0 }
 0x259   :  { %v380_v5 = vpop.xlane.xlu1 %379 }
 0x25a   :  { %v810_v6 = vpop.eup %809  ;;  %v392_v7 = vmul.f32 0.010416667, %v380_v5  ;;  %v409_v12 = vadd.f32 1e-05, %v403_v4 }
 0x25b   :  { %v412_v11 = vmul.f32 %v810_v6, %v408_v61  ;;  %v389_v13 = vpop.xlane.xlu2 %388  ;;  %vm418_vm9 = vweird.f32 %v810_v6 }
 0x25c   :  { %v398_v14 = vmul.f32 %v392_v7, %v392_v7  ;;  %v395_v16 = vmul.f32 0.010416667, %v389_v13  ;;  %811 = vrsqrt.f32 %v409_v12  ;;  %vm419_vm11 = vmor %vm417_vm10, %vm418_vm9  ;;  %vm427_vm13 = vweird.f32 %v409_v12 }
 0x25d   :  { %v413_v17 = vmul.f32 %v810_v6, %v412_v11  ;;  %v407_v40 = vsub.f32 %v1093_v43, %v392_v7 }
 0x25e   :  { %v401_v19 = vsub.f32 %v395_v16, %v398_v14 }
 0x25f   :  { %v414_v15 = vmul.f32 0.5, %v413_v17 }
 0x260   :  { %v404_v21 = vmax.f32 %v401_v19, 0.0 }
 0x261   :  { %v415_v22 = vsub.f32 1.5, %v414_v15 }
 0x262   :  { %v410_v23 = vadd.f32 1e-05, %v404_v21  ;;  %v812_v24 = vpop.eup %811 }
 0x263   :  { %v416_v25 = vmul.f32 %v810_v6, %v415_v22  ;;  %v422_v26 = vmul.f32 %v812_v24, %v409_v12  ;;  %vm428_vm12 = vweird.f32 %v812_v24 }
 0x264   :  { %813 = vrsqrt.f32 %v410_v23  ;;  %vm429_vm14 = vmor %vm427_vm13, %vm428_vm12  ;;  %vm437_vm0 = vweird.f32 %v410_v23 }
 0x265   :  { %v423_v27 = vmul.f32 %v812_v24, %v422_v26  ;;  %v420_v28 = vsel %vm419_vm11, %v810_v6, %v416_v25 }
 0x266   :  { %v441_v30 = vmul.f32 %v420_v28, %v405_v20 }
 0x267   :  { %v424_v29 = vmul.f32 0.5, %v423_v27 }
 0x268   :  { %v447_v18 = vmul.f32 %v798_v31, %v441_v30 }
 0x269   :  { %v425_v33 = vsub.f32 1.5, %v424_v29 }
 0x26a   :  { %v814_v32 = vpop.eup %813  ;;  %v453_v46 = vadd.f32 %v799_v38, %v447_v18 }
 0x26b   :  { %v432_v34 = vmul.f32 %v814_v32, %v410_v23  ;;  %v426_v35 = vmul.f32 %v812_v24, %v425_v33  ;;  %vm438_vm15 = vweird.f32 %v814_v32 }
 0x26c   :  { %vm439_vm1 = vmor %vm437_vm0, %vm438_vm15  ;;  %v456_v49 = vmax.f32 %v453_v46, 0.0  ;;  %v802_v46 = vld [vmem:[%s1149_s12] ss:$0 sm:$0xff] }
 0x26d   :  { %v433_v37 = vmul.f32 %v814_v32, %v432_v34  ;;  %v430_v39 = vsel %vm429_vm14, %v812_v24, %v426_v35 }
 0x26e   :  { %v442_v42 = vmul.f32 %v430_v39, %v406_v36 }
 0x26f   :  { %v434_v41 = vmul.f32 0.5, %v433_v37 }
 0x270   :  { %v448_v45 = vmul.f32 %v798_v31, %v442_v42 }
 0x271   :  { %v435_v44 = vsub.f32 1.5, %v434_v41  ;;  %v801_v41 = vld [vmem:[%s1148_s11] ss:$0 sm:$0xff]  ;;  %s957_s11 = smov [#allocation10]  }
 0x272   :  { %v454_v47 = vadd.f32 %v799_v38, %v448_v45  ;;  %s640_s12 = sshll.u32 %s957_s11, 4  ;;  %s641_s12 = int_to_ptr.vmem [resolvable:$true] %s640_s12 }
 0x273   :  { %v436_v48 = vmul.f32 %v814_v32, %v435_v44 }
 0x274   :  { %v457_v50 = vmax.f32 %v454_v47, 0.0 }
 0x275   :  { %v440_v51 = vsel %vm439_vm1, %v814_v32, %v436_v48 }
 0x276   :  { %v459_v52 = vpack.c.bf16 %v457_v50, %v456_v49  ;;  %v443_v53 = vmul.f32 %v440_v51, %v407_v40 }
 0x278   :  { %537 = vmatmul.bf16.vlgmr.msra.gmra.mxu2 %v459_v52  ;;  %v449_v54 = vmul.f32 %v798_v31, %v443_v53 }
 0x27a   :  { %v455_v55 = vadd.f32 %v799_v38, %v449_v54 }
 0x27c   :  { %v458_v56 = vmax.f32 %v455_v55, 0.0 }
 0x27e   :  { %v460_v57 = vpack.c.bf16 %v458_v56, %v458_v56 }
 0x288   :  { %542 = vmatmul.bf16.gmra.mxu2 %v460_v57 }
 0x2fb   :  { %v538_v59 = vpop.f32.mrf.mxu2 }
 0x2fc   :  { %v539_v60 = vadd.f32 %v800_v58, %v538_v59 }
 0x2fe   :  { %v547_v61 = vadd.f32 %v539_v60, %v1043_v8 }
 0x300   :  { %552 = vadd.xlane.f32.xlu0 %v547_v61  ;;  %v558_v0 = vmul.f32 %v547_v61, %v547_v61 }
 0x303   :  { %v540_v43 = vpop.f32.mrf.mxu2 }
 0x304   :  { %v541_v62 = vadd.f32 %v800_v58, %v540_v43 }
 0x306   :  { %v1112_v63 = vadd.f32 %v541_v62, %v1045_v9 }
 0x308   :  { %554 = vadd.xlane.f32.xlu1 %v1112_v63  ;;  %561 = vadd.xlane.f32.xlu0 %v558_v0  ;;  %v559_v4 = vmul.f32 %v1112_v63, %v1112_v63 }
 0x30b   :  { %v543_v1 = vpop.f32.mrf.mxu2 }
 0x30c   :  { %v544_v2 = vadd.f32 %v800_v58, %v543_v1 }
 0x30e   :  { %v1116_v3 = vadd.f32 %v544_v2, %v1047_v10 }
 0x310   :  { %563 = vadd.xlane.f32.xlu1 %v559_v4  ;;  %556 = vadd.xlane.f32.xlu2 %v1116_v3  ;;  %v560_v9 = vmul.f32 %v1116_v3, %v1116_v3 }
 0x313   :  { %v545_v8 = vpop.f32.mrf.mxu2 }
 0x318   :  { %565 = vadd.xlane.f32.xlu2 %v560_v9 }
 0x373   :  { %v553_v5 = vpop.xlane.xlu0 %552 }
 0x374   :  { %v567_v6 = vmul.f32 0.01, %v553_v5 }
 0x376   :  { %v573_v12 = vmul.f32 %v567_v6, %v567_v6  ;;  %v582_v39 = vsub.f32 %v547_v61, %v567_v6 }
 0x37b   :  { %v555_v7 = vpop.xlane.xlu1 %554  ;;  %v562_v11 = vpop.xlane.xlu0 %561 }
 0x37c   :  { %v570_v13 = vmul.f32 0.01, %v562_v11  ;;  %v568_v10 = vmul.f32 0.01, %v555_v7 }
 0x37e   :  { %v576_v14 = vsub.f32 %v570_v13, %v573_v12  ;;  %v574_v21 = vmul.f32 %v568_v10, %v568_v10  ;;  %v583_v53 = vsub.f32 %v1112_v63, %v568_v10 }
 0x380   :  { %v579_v16 = vmax.f32 %v576_v14, 0.0 }
 0x382   :  { %v585_v17 = vadd.f32 1e-05, %v579_v16 }
 0x383   :  { %v564_v19 = vpop.xlane.xlu1 %563  ;;  %v557_v15 = vpop.xlane.xlu2 %556 }
 0x384   :  { %815 = vrsqrt.f32 %v585_v17  ;;  %v571_v22 = vmul.f32 0.01, %v564_v19  ;;  %v569_v25 = vmul.f32 0.01, %v557_v15  ;;  %vm594_vm3 = vweird.f32 %v585_v17 }
 0x386   :  { %v577_v23 = vsub.f32 %v571_v22, %v574_v21  ;;  %v575_v29 = vmul.f32 %v569_v25, %v569_v25  ;;  %v584_v43 = vsub.f32 %v1116_v3, %v569_v25 }
 0x388   :  { %v580_v24 = vmax.f32 %v577_v23, 0.0 }
 0x38a   :  { %v816_v26 = vpop.eup %815  ;;  %v586_v27 = vadd.f32 1e-05, %v580_v24 }
 0x38b   :  { %v589_v28 = vmul.f32 %v816_v26, %v585_v17  ;;  %v566_v20 = vpop.xlane.xlu2 %565  ;;  %vm595_vm2 = vweird.f32 %v816_v26 }
 0x38c   :  { %817 = vrsqrt.f32 %v586_v27  ;;  %v572_v30 = vmul.f32 0.01, %v566_v20  ;;  %vm596_vm4 = vmor %vm594_vm3, %vm595_vm2  ;;  %vm604_vm6 = vweird.f32 %v586_v27 }
 0x38d   :  { %v590_v31 = vmul.f32 %v816_v26, %v589_v28 }
 0x38e   :  { %v578_v32 = vsub.f32 %v572_v30, %v575_v29 }
 0x38f   :  { %v591_v33 = vmul.f32 0.5, %v590_v31 }
 0x390   :  { %v581_v34 = vmax.f32 %v578_v32, 0.0 }
 0x391   :  { %v592_v35 = vsub.f32 1.5, %v591_v33 }
 0x392   :  { %v818_v36 = vpop.eup %817  ;;  %v587_v37 = vadd.f32 1e-05, %v581_v34 }
 0x393   :  { %v593_v18 = vmul.f32 %v816_v26, %v592_v35  ;;  %v599_v38 = vmul.f32 %v818_v36, %v586_v27  ;;  %vm605_vm5 = vweird.f32 %v818_v36 }
 0x394   :  { %819 = vrsqrt.f32 %v587_v37  ;;  %vm606_vm7 = vmor %vm604_vm6, %vm605_vm5  ;;  %vm614_vm9 = vweird.f32 %v587_v37 }
 0x395   :  { %v597_v42 = vsel %vm596_vm4, %v816_v26, %v593_v18  ;;  %v600_v44 = vmul.f32 %v818_v36, %v599_v38 }
 0x396   :  { %v618_v45 = vmul.f32 %v597_v42, %v582_v39 }
 0x397   :  { %v601_v47 = vmul.f32 0.5, %v600_v44 }
 0x398   :  { %v624_v48 = vmul.f32 %v801_v41, %v618_v45 }
 0x399   :  { %v602_v40 = vsub.f32 1.5, %v601_v47 }
 0x39a   :  { %v820_v49 = vpop.eup %819  ;;  %v630_v50 = vadd.f32 %v802_v46, %v624_v48 }
 0x39b   :  { %v603_v51 = vmul.f32 %v818_v36, %v602_v40  ;;  %v609_v52 = vmul.f32 %v820_v49, %v587_v37  ;;  %vm615_vm8 = vweird.f32 %v820_v49 }
 0x39c   :  { %633 = vst [vmem:[#allocation10] sm:$0xff] %v630_v50  ;;  %vm616_vm10 = vmor %vm614_vm9, %vm615_vm8 }
 0x39d   :  { %v607_v54 = vsel %vm606_vm7, %v818_v36, %v603_v51  ;;  %v610_v55 = vmul.f32 %v820_v49, %v609_v52 }
 0x39e   :  { %v619_v56 = vmul.f32 %v607_v54, %v583_v53 }
 0x39f   :  { %v611_v57 = vmul.f32 0.5, %v610_v55 }
 0x3a0   :  { %v625_v58 = vmul.f32 %v801_v41, %v619_v56 }
 0x3a1   :  { %v612_v59 = vsub.f32 1.5, %v611_v57 }
 0x3a2   :  { %v631_v60 = vadd.f32 %v802_v46, %v625_v58 }
 0x3a3   :  { %v613_v61 = vmul.f32 %v820_v49, %v612_v59 }
 0x3a4   :  { %634 = vst [vmem:[#allocation10 + $0x8] sm:$0xff] %v631_v60 }
 0x3a5   :  { %v617_v62 = vsel %vm616_vm10, %v820_v49, %v613_v61 }
 0x3a6   :  { %v620_v0 = vmul.f32 %v617_v62, %v584_v43 }
 0x3a8   :  { %v626_v63 = vmul.f32 %v801_v41, %v620_v0 }
 0x3aa   :  { %v632_v1 = vadd.f32 %v802_v46, %v626_v63 }
 0x3ac   :  { %635 = vst [vmem:[#allocation10 + $0x10] sm:$0xff] %v632_v1 }
 0x3ad   :  { %648 = dma.vmem_to_hbm [thread:$0]  %s641_s12, 384, %s643_s0, [#allocation4], %s953_s20, %s953_s20, %s954_s21  }
 0x3ae   :  { %947 = dma.done.wait [#allocation4], 384  }
 0x3af   :  { %948 = vsyncadd [#allocation4], 4294966912 }
 0x3b0   :  { %653 = vsyncpa [#allocation3], 1 }
 0x3b1   :  { %654 = vsyncpa [#allocation6], 1 }
 0x3b2   :  { %655 = vsyncpa [#allocation9], 1 }
 0x3b3   :  { %656 = vsyncpa [#allocation4], 1 }

</bundles_post_ra>
